<compile_context>
chip_gen: v7x
topology: tpu7x:2x2x1
jax: 0.10.0
libtpu: 0.0.40
codegen_flags: <defaults>
</compile_context>

<pallas_src>
import jax
import jax.numpy as jnp
import numpy as np
from jax.experimental import pallas as pl
from jax.experimental.pallas import tpu as pltpu


def _layer_schedule(n_blocks, n_layers, kernel_size, dilation_base):
    """Static (dilation, conv_padding) per residual layer, mirroring WaveNet.__init__."""
    sched = []
    for b in range(n_blocks):
        d = dilation_base ** b
        pad = (kernel_size - 1) * d // 2  # the module's extra `padding` term is always 0
        for _ in range(n_layers):
            sched.append((d, pad))
    return sched


def _frame_width(L, sched, K):
    """Smallest multiple of 128 such that circular rolls never alias valid data."""
    need = L
    cur = L
    for d, pad in sched:
        out_len = cur + 2 * pad - d * (K - 1)
        need = max(need, cur + pad, out_len + ((K - 1) * d - pad))
        cur = out_len
    return max(128, -(-need // 128) * 128)


def make_wavenet_kernel(C, F, K, W, L, sched):
    """One grid step = one batch element; activations live in vregs as (F, W)."""

    def kernel(x_ref, wi_ref, bi_ref, w2_ref, b2_ref, wo_ref, bo_ref, out_ref):
        f32 = jnp.float32
        lane = jax.lax.broadcasted_iota(jnp.int32, (F, W), 1)   # hoisted lane index

        # conv_in (1x1): h[f, t] = sum_c wi[f, c] * x[c, t] + bi[f]
        x = x_ref[0]                                   # (C, W), lane-dense
        wi = wi_ref[...]                               # (F, C)
        h = jnp.broadcast_to(bi_ref[...], (F, W)).astype(f32)
        for c in range(C):
            h = h + wi[:, c:c + 1] * x[c:c + 1, :]     # rank-1 FMA on (F, W)

        skip = jnp.zeros((F, W), f32)                  # full-width skip accumulator
        cur_len = L
        for li, (d, pad) in enumerate(sched):
            out_len = cur_len + 2 * pad - d * (K - 1)
            # Zero the invalid tail so circular rolls reproduce zero padding exactly.
            h_m = jnp.where(lane < cur_len, h, 0.0)

            wl = w2_ref[li]                            # (K*F, 2F, 1) one bulk weight load
            conv2 = jnp.zeros((2 * F, W), f32) + b2_ref[li]   # (2F, W), filt & gate fused
            for j in range(K):                         # dilated taps via lane rotation
                s = j * d - pad
                r = h_m if s == 0 else pltpu.roll(h_m, shift=(-s) % W, axis=1)
                for c in range(F):                     # rank-1 FMA on full (2F, W) slabs
                    conv2 = conv2 + wl[j * F + c] * r[c:c + 1, :]

            conv_d, conv_g = conv2[:F], conv2[F:]
            # Exact sigmoid kept for f32 parity with the reference
            # (pl.reciprocal(approx=True) would route to EUP but costs ~1e-3 accuracy).
            gated = conv_d * (1.0 / (1.0 + jnp.exp(-conv_g)))

            skip = skip + gated                        # truncation to max_length is done
                                                       # lane-dense in the wrapper
            delta = cur_len - out_len                  # residual uses last out_len of h
            res = h_m if delta == 0 else pltpu.roll(h_m, shift=(-delta) % W, axis=1)
            h = res + gated
            cur_len = out_len

        y = jnp.maximum(skip, 0.0)                     # ReLU
        wo = wo_ref[...]                               # (C, F)
        out = jnp.broadcast_to(bo_ref[...], (C, W)).astype(f32)
        for f in range(F):
            out = out + wo[:, f:f + 1] * y[f:f + 1, :]
        out_ref[0] = out                               # full lane-dense store

    return kernel


def wavenet_pallas(x, params, *, n_filters, kernel_size, n_layers, n_blocks,
                   dilation_base):
    N, C, L = x.shape
    F, K = n_filters, kernel_size
    sched = _layer_schedule(n_blocks, n_layers, K, dilation_base)
    Ltot = len(sched)
    W = _frame_width(L, sched, K)

    # PyTorch quirk: len() of a 3-D skip tensor is its batch dim.
    max_length = N
    cur = L
    for d, pad in sched:
        cur = cur + 2 * pad - d * (K - 1)
        assert cur >= max_length, "PyTorch forward would fail on mismatched skip sums"

    wi, bi, Wd, Bd, Wg, Bg, wo, bo = params
    f32 = jnp.float32

    # Lane-dense input: (N, C, W), time axis zero-padded to W lanes.
    x_pad = jnp.pad(x.astype(f32), ((0, 0), (0, 0), (0, W - L)))

    # Stage weights.  Filter & gate are fused along the output-channel axis so the
    # kernel sees one (K*F_in, 2F_out, 1) table per layer (output channels on sublanes).
    wi_k = wi[:, :, 0].astype(f32)                          # (F, C)
    bi_k = bi.astype(f32)[:, None]                          # (F, 1)
    w2 = jnp.concatenate([Wd, Wg], axis=1).astype(f32)      # (Ltot, 2F, F, K)
    w2 = jnp.transpose(w2, (0, 3, 2, 1))                    # (Ltot, K, F, 2F)
    w2 = w2.reshape(Ltot, K * F, 2 * F)[..., None]          # (Ltot, K*F, 2F, 1)
    b2 = jnp.concatenate([Bd, Bg], axis=1).astype(f32)[..., None]   # (Ltot, 2F, 1)
    wo_k = wo[:, :, 0].astype(f32)                          # (C, F)
    bo_k = bo.astype(f32)[:, None]                          # (C, 1)

    kernel = make_wavenet_kernel(C, F, K, W, L, sched)
    out_full = pl.pallas_call(
        kernel,
        out_shape=jax.ShapeDtypeStruct((N, C, W), f32),
        grid=(N,),
        in_specs=[
            pl.BlockSpec((1, C, W), lambda n: (n, 0, 0)),                   # x (per batch)
            pl.BlockSpec((F, C), lambda n: (0, 0)),                         # conv_in w
            pl.BlockSpec((F, 1), lambda n: (0, 0)),                         # conv_in b
            pl.BlockSpec((Ltot, K * F, 2 * F, 1), lambda n: (0, 0, 0, 0)),  # fused res w
            pl.BlockSpec((Ltot, 2 * F, 1), lambda n: (0, 0, 0)),            # fused res b
            pl.BlockSpec((C, F), lambda n: (0, 0)),                         # conv_out w
            pl.BlockSpec((C, 1), lambda n: (0, 0)),                         # conv_out b
        ],
        out_specs=pl.BlockSpec((1, C, W), lambda n: (n, 0, 0)),
        compiler_params=pltpu.CompilerParams(
            dimension_semantics=("parallel",)),
    )(x_pad, wi_k, bi_k, w2, b2, wo_k, bo_k)

    # PyTorch len()-of-3D-tensor quirk: truncate time to the batch size.
    return out_full[:, :, :max_length]


def wavenet_ref(x, params, *, n_filters, kernel_size, n_layers, n_blocks,
                dilation_base):
    """Pure-JAX reference (mirrors the PyTorch forward semantics)."""
    wi, bi, Wd, Bd, Wg, Bg, wo, bo = params
    K = kernel_size
    sched = _layer_schedule(n_blocks, n_layers, K, dilation_base)
    N = x.shape[0]

    h = jnp.einsum('fc,ncl->nfl', wi[:, :, 0], x) + bi[None, :, None]
    skips = []
    for li, (d, pad) in enumerate(sched):
        cur_len = h.shape[2]
        out_len = cur_len + 2 * pad - d * (K - 1)
        hp = jnp.pad(h, ((0, 0), (0, 0), (pad, pad)))
        cd = jnp.zeros((N, n_filters, out_len)) + Bd[li][None, :, None]
        cg = jnp.zeros((N, n_filters, out_len)) + Bg[li][None, :, None]
        for j in range(K):
            seg = hp[:, :, j * d:j * d + out_len]
            cd = cd + jnp.einsum('oc,ncl->nol', Wd[li, :, :, j], seg)
            cg = cg + jnp.einsum('oc,ncl->nol', Wg[li, :, :, j], seg)
        gated = cd * (1.0 / (1.0 + jnp.exp(-cg)))
        skips.append(gated)
        h = h[:, :, cur_len - out_len:] + gated
    max_length = N  # PyTorch len(3-D tensor) == batch dim
    s = sum(sk[:, :, :max_length] for sk in skips)
    y = jnp.maximum(s, 0.0)
    return jnp.einsum('of,nfl->nol', wo[:, :, 0], y) + bo[None, :, None]


if __name__ == "__main__":
    # Small config consistent with the module: WaveNet(sequence_length=16,
    # n_channels=1, n_layers=3, n_blocks=2, n_filters=4, kernel_size=2, dilation_base=2)
    N, C, L = 2, 1, 16
    n_filters, kernel_size = 4, 2
    n_layers, n_blocks, dilation_base = 3, 2, 2
    Ltot = n_layers * n_blocks

    key = jax.random.PRNGKey(0)
    ks = jax.random.split(key, 10)
    x = jax.random.normal(ks[0], (N, C, L), jnp.float32)
    wi = 0.5 * jax.random.normal(ks[1], (n_filters, C, 1), jnp.float32)
    bi = 0.1 * jax.random.normal(ks[2], (n_filters,), jnp.float32)
    Wd = 0.5 * jax.random.normal(ks[3], (Ltot, n_filters, n_filters, kernel_size), jnp.float32)
    Bd = 0.1 * jax.random.normal(ks[4], (Ltot, n_filters), jnp.float32)
    Wg = 0.5 * jax.random.normal(ks[5], (Ltot, n_filters, n_filters, kernel_size), jnp.float32)
    Bg = 0.1 * jax.random.normal(ks[6], (Ltot, n_filters), jnp.float32)
    wo = 0.5 * jax.random.normal(ks[7], (C, n_filters, 1), jnp.float32)
    bo = 0.1 * jax.random.normal(ks[8], (C,), jnp.float32)
    params = (wi, bi, Wd, Bd, Wg, Bg, wo, bo)

    out = wavenet_pallas(x, params, n_filters=n_filters, kernel_size=kernel_size,
                         n_layers=n_layers, n_blocks=n_blocks,
                         dilation_base=dilation_base)
    out = jax.block_until_ready(out)

    ref = wavenet_ref(x, params, n_filters=n_filters, kernel_size=kernel_size,
                      n_layers=n_layers, n_blocks=n_blocks,
                      dilation_base=dilation_base)

    assert out.shape == (N, C, N)  # last dim == batch size due to PyTorch len() quirk
    np.testing.assert_allclose(np.asarray(out), np.asarray(ref), rtol=1e-5, atol=1e-5)
    print("KERNEL_OK")
</pallas_src>

<mosaic_0001>
module attributes {stable_mosaic.version = 11 : i64} {
  func.func @kernel(%arg0: i32, %arg1: memref<1x1x128xf32, #tpu.memory_space<vmem>>, %arg2: memref<4x1xf32, #tpu.memory_space<vmem>>, %arg3: memref<4x1xf32, #tpu.memory_space<vmem>>, %arg4: memref<6x8x8x1xf32, #tpu.memory_space<vmem>>, %arg5: memref<6x8x1xf32, #tpu.memory_space<vmem>>, %arg6: memref<1x4xf32, #tpu.memory_space<vmem>>, %arg7: memref<1x1xf32, #tpu.memory_space<vmem>>, %arg8: memref<1x1x128xf32, #tpu.memory_space<vmem>>) attributes {dimension_semantics = [#tpu.dimension_semantics<parallel>], iteration_bounds = array<i64: 2>, scalar_prefetch = 0 : i64, scratch_operands = 0 : i64, tpu.core_type = #tpu.core_type<tc>, window_params = [{transform_indices = @transform_0, window_bounds = array<i64: 1, 1, 128>}, {pipeline_mode = #tpu.pipeline_mode<synchronous>, transform_indices = @transform_1, window_bounds = array<i64: 4, 1>}, {pipeline_mode = #tpu.pipeline_mode<synchronous>, transform_indices = @transform_2, window_bounds = array<i64: 4, 1>}, {pipeline_mode = #tpu.pipeline_mode<synchronous>, transform_indices = @transform_3, window_bounds = array<i64: 6, 8, 8, 1>}, {pipeline_mode = #tpu.pipeline_mode<synchronous>, transform_indices = @transform_4, window_bounds = array<i64: 6, 8, 1>}, {pipeline_mode = #tpu.pipeline_mode<synchronous>, transform_indices = @transform_5, window_bounds = array<i64: 1, 4>}, {pipeline_mode = #tpu.pipeline_mode<synchronous>, transform_indices = @transform_6, window_bounds = array<i64: 1, 1>}, {transform_indices = @transform_7, window_bounds = array<i64: 1, 1, 128>}]} {
    %0 = tpu.iota {dimensions = array<i32: 1>} : vector<4x128xi32>
    %c0 = arith.constant 0 : index
    %c0_0 = arith.constant 0 : index
    %c0_1 = arith.constant 0 : index
    %1 = vector.load %arg1[%c0, %c0_0, %c0_1] : memref<1x1x128xf32, #tpu.memory_space<vmem>>, vector<1x1x128xf32>
    %2 = vector.shape_cast %1 : vector<1x1x128xf32> to vector<1x128xf32>
    %c0_2 = arith.constant 0 : index
    %c0_3 = arith.constant 0 : index
    %3 = vector.load %arg2[%c0_2, %c0_3] : memref<4x1xf32, #tpu.memory_space<vmem>>, vector<4x1xf32>
    %c0_4 = arith.constant 0 : index
    %c0_5 = arith.constant 0 : index
    %4 = vector.load %arg3[%c0_4, %c0_5] : memref<4x1xf32, #tpu.memory_space<vmem>>, vector<4x1xf32>
    %5 = vector.shape_cast %4 : vector<4x1xf32> to vector<4x1xf32>
    %6 = vector.broadcast %5 : vector<4x1xf32> to vector<4x128xf32>
    %7 = vector.broadcast %3 : vector<4x1xf32> to vector<4x128xf32>
    %8 = vector.broadcast %2 : vector<1x128xf32> to vector<4x128xf32>
    %9 = arith.mulf %7, %8 : vector<4x128xf32>
    %10 = arith.addf %6, %9 : vector<4x128xf32>
    %cst = arith.constant 0.000000e+00 : f32
    %11 = vector.broadcast %cst : f32 to vector<4x128xf32>
    %c16_i32 = arith.constant 16 : i32
    %12 = vector.broadcast %c16_i32 : i32 to vector<4x128xi32>
    %13 = arith.cmpi slt, %0, %12 : vector<4x128xi32>
    %cst_6 = arith.constant 0.000000e+00 : f32
    %14 = vector.broadcast %cst_6 : f32 to vector<4x128xf32>
    %15 = arith.select %13, %10, %14 : vector<4x128xi1>, vector<4x128xf32>
    %c0_7 = arith.constant 0 : index
    %c0_8 = arith.constant 0 : index
    %c0_9 = arith.constant 0 : index
    %c0_10 = arith.constant 0 : index
    %16 = vector.load %arg4[%c0_7, %c0_8, %c0_9, %c0_10] : memref<6x8x8x1xf32, #tpu.memory_space<vmem>>, vector<1x8x8x1xf32>
    %17 = vector.shape_cast %16 : vector<1x8x8x1xf32> to vector<8x8x1xf32>
    %cst_11 = arith.constant 0.000000e+00 : f32
    %18 = vector.broadcast %cst_11 : f32 to vector<8x128xf32>
    %c0_12 = arith.constant 0 : index
    %c0_13 = arith.constant 0 : index
    %c0_14 = arith.constant 0 : index
    %19 = vector.load %arg5[%c0_12, %c0_13, %c0_14] : memref<6x8x1xf32, #tpu.memory_space<vmem>>, vector<1x8x1xf32>
    %20 = vector.shape_cast %19 : vector<1x8x1xf32> to vector<8x1xf32>
    %21 = vector.broadcast %20 : vector<8x1xf32> to vector<8x128xf32>
    %22 = arith.addf %18, %21 : vector<8x128xf32>
    %23 = vector.extract_strided_slice %17 {offsets = [0, 0, 0], sizes = [1, 8, 1], strides = [1, 1, 1]} : vector<8x8x1xf32> to vector<1x8x1xf32>
    %24 = vector.shape_cast %23 : vector<1x8x1xf32> to vector<8x1xf32>
    %25 = vector.extract_strided_slice %15 {offsets = [0, 0], sizes = [1, 128], strides = [1, 1]} : vector<4x128xf32> to vector<1x128xf32>
    %26 = vector.broadcast %24 : vector<8x1xf32> to vector<8x128xf32>
    %27 = vector.broadcast %25 : vector<1x128xf32> to vector<8x128xf32>
    %28 = arith.mulf %26, %27 : vector<8x128xf32>
    %29 = arith.addf %22, %28 : vector<8x128xf32>
    %30 = vector.extract_strided_slice %17 {offsets = [1, 0, 0], sizes = [1, 8, 1], strides = [1, 1, 1]} : vector<8x8x1xf32> to vector<1x8x1xf32>
    %31 = vector.shape_cast %30 : vector<1x8x1xf32> to vector<8x1xf32>
    %32 = vector.extract_strided_slice %15 {offsets = [1, 0], sizes = [1, 128], strides = [1, 1]} : vector<4x128xf32> to vector<1x128xf32>
    %33 = vector.broadcast %31 : vector<8x1xf32> to vector<8x128xf32>
    %34 = vector.broadcast %32 : vector<1x128xf32> to vector<8x128xf32>
    %35 = arith.mulf %33, %34 : vector<8x128xf32>
    %36 = arith.addf %29, %35 : vector<8x128xf32>
    %37 = vector.extract_strided_slice %17 {offsets = [2, 0, 0], sizes = [1, 8, 1], strides = [1, 1, 1]} : vector<8x8x1xf32> to vector<1x8x1xf32>
    %38 = vector.shape_cast %37 : vector<1x8x1xf32> to vector<8x1xf32>
    %39 = vector.extract_strided_slice %15 {offsets = [2, 0], sizes = [1, 128], strides = [1, 1]} : vector<4x128xf32> to vector<1x128xf32>
    %40 = vector.broadcast %38 : vector<8x1xf32> to vector<8x128xf32>
    %41 = vector.broadcast %39 : vector<1x128xf32> to vector<8x128xf32>
    %42 = arith.mulf %40, %41 : vector<8x128xf32>
    %43 = arith.addf %36, %42 : vector<8x128xf32>
    %44 = vector.extract_strided_slice %17 {offsets = [3, 0, 0], sizes = [1, 8, 1], strides = [1, 1, 1]} : vector<8x8x1xf32> to vector<1x8x1xf32>
    %45 = vector.shape_cast %44 : vector<1x8x1xf32> to vector<8x1xf32>
    %46 = vector.extract_strided_slice %15 {offsets = [3, 0], sizes = [1, 128], strides = [1, 1]} : vector<4x128xf32> to vector<1x128xf32>
    %47 = vector.broadcast %45 : vector<8x1xf32> to vector<8x128xf32>
    %48 = vector.broadcast %46 : vector<1x128xf32> to vector<8x128xf32>
    %49 = arith.mulf %47, %48 : vector<8x128xf32>
    %50 = arith.addf %43, %49 : vector<8x128xf32>
    %c127_i32 = arith.constant 127 : i32
    %51 = tpu.dynamic_rotate %15 by %c127_i32 dim 1 : vector<4x128xf32>, i32 -> vector<4x128xf32>
    %52 = vector.extract_strided_slice %17 {offsets = [4, 0, 0], sizes = [1, 8, 1], strides = [1, 1, 1]} : vector<8x8x1xf32> to vector<1x8x1xf32>
    %53 = vector.shape_cast %52 : vector<1x8x1xf32> to vector<8x1xf32>
    %54 = vector.extract_strided_slice %51 {offsets = [0, 0], sizes = [1, 128], strides = [1, 1]} : vector<4x128xf32> to vector<1x128xf32>
    %55 = vector.broadcast %53 : vector<8x1xf32> to vector<8x128xf32>
    %56 = vector.broadcast %54 : vector<1x128xf32> to vector<8x128xf32>
    %57 = arith.mulf %55, %56 : vector<8x128xf32>
    %58 = arith.addf %50, %57 : vector<8x128xf32>
    %59 = vector.extract_strided_slice %17 {offsets = [5, 0, 0], sizes = [1, 8, 1], strides = [1, 1, 1]} : vector<8x8x1xf32> to vector<1x8x1xf32>
    %60 = vector.shape_cast %59 : vector<1x8x1xf32> to vector<8x1xf32>
    %61 = vector.extract_strided_slice %51 {offsets = [1, 0], sizes = [1, 128], strides = [1, 1]} : vector<4x128xf32> to vector<1x128xf32>
    %62 = vector.broadcast %60 : vector<8x1xf32> to vector<8x128xf32>
    %63 = vector.broadcast %61 : vector<1x128xf32> to vector<8x128xf32>
    %64 = arith.mulf %62, %63 : vector<8x128xf32>
    %65 = arith.addf %58, %64 : vector<8x128xf32>
    %66 = vector.extract_strided_slice %17 {offsets = [6, 0, 0], sizes = [1, 8, 1], strides = [1, 1, 1]} : vector<8x8x1xf32> to vector<1x8x1xf32>
    %67 = vector.shape_cast %66 : vector<1x8x1xf32> to vector<8x1xf32>
    %68 = vector.extract_strided_slice %51 {offsets = [2, 0], sizes = [1, 128], strides = [1, 1]} : vector<4x128xf32> to vector<1x128xf32>
    %69 = vector.broadcast %67 : vector<8x1xf32> to vector<8x128xf32>
    %70 = vector.broadcast %68 : vector<1x128xf32> to vector<8x128xf32>
    %71 = arith.mulf %69, %70 : vector<8x128xf32>
    %72 = arith.addf %65, %71 : vector<8x128xf32>
    %73 = vector.extract_strided_slice %17 {offsets = [7, 0, 0], sizes = [1, 8, 1], strides = [1, 1, 1]} : vector<8x8x1xf32> to vector<1x8x1xf32>
    %74 = vector.shape_cast %73 : vector<1x8x1xf32> to vector<8x1xf32>
    %75 = vector.extract_strided_slice %51 {offsets = [3, 0], sizes = [1, 128], strides = [1, 1]} : vector<4x128xf32> to vector<1x128xf32>
    %76 = vector.broadcast %74 : vector<8x1xf32> to vector<8x128xf32>
    %77 = vector.broadcast %75 : vector<1x128xf32> to vector<8x128xf32>
    %78 = arith.mulf %76, %77 : vector<8x128xf32>
    %79 = arith.addf %72, %78 : vector<8x128xf32>
    %80 = vector.extract_strided_slice %79 {offsets = [0, 0], sizes = [4, 128], strides = [1, 1]} : vector<8x128xf32> to vector<4x128xf32>
    %81 = vector.extract_strided_slice %79 {offsets = [4, 0], sizes = [4, 128], strides = [1, 1]} : vector<8x128xf32> to vector<4x128xf32>
    %cst_15 = arith.constant 0.000000e+00 : f32
    %82 = vector.broadcast %cst_15 : f32 to vector<4x128xf32>
    %83 = arith.subf %82, %81 : vector<4x128xf32>
    %84 = math.exp %83 : vector<4x128xf32>
    %cst_16 = arith.constant 1.000000e+00 : f32
    %85 = vector.broadcast %cst_16 : f32 to vector<4x128xf32>
    %86 = arith.addf %85, %84 : vector<4x128xf32>
    %cst_17 = arith.constant 1.000000e+00 : f32
    %87 = vector.broadcast %cst_17 : f32 to vector<4x128xf32>
    %88 = arith.divf %87, %86 : vector<4x128xf32>
    %89 = arith.mulf %80, %88 : vector<4x128xf32>
    %90 = arith.addf %11, %89 : vector<4x128xf32>
    %c127_i32_18 = arith.constant 127 : i32
    %91 = tpu.dynamic_rotate %15 by %c127_i32_18 dim 1 : vector<4x128xf32>, i32 -> vector<4x128xf32>
    %92 = arith.addf %91, %89 : vector<4x128xf32>
    %c15_i32 = arith.constant 15 : i32
    %93 = vector.broadcast %c15_i32 : i32 to vector<4x128xi32>
    %94 = arith.cmpi slt, %0, %93 : vector<4x128xi32>
    %cst_19 = arith.constant 0.000000e+00 : f32
    %95 = vector.broadcast %cst_19 : f32 to vector<4x128xf32>
    %96 = arith.select %94, %92, %95 : vector<4x128xi1>, vector<4x128xf32>
    %c1 = arith.constant 1 : index
    %c0_20 = arith.constant 0 : index
    %c0_21 = arith.constant 0 : index
    %c0_22 = arith.constant 0 : index
    %97 = vector.load %arg4[%c1, %c0_20, %c0_21, %c0_22] : memref<6x8x8x1xf32, #tpu.memory_space<vmem>>, vector<1x8x8x1xf32>
    %98 = vector.shape_cast %97 : vector<1x8x8x1xf32> to vector<8x8x1xf32>
    %cst_23 = arith.constant 0.000000e+00 : f32
    %99 = vector.broadcast %cst_23 : f32 to vector<8x128xf32>
    %c1_24 = arith.constant 1 : index
    %c0_25 = arith.constant 0 : index
    %c0_26 = arith.constant 0 : index
    %100 = vector.load %arg5[%c1_24, %c0_25, %c0_26] : memref<6x8x1xf32, #tpu.memory_space<vmem>>, vector<1x8x1xf32>
    %101 = vector.shape_cast %100 : vector<1x8x1xf32> to vector<8x1xf32>
    %102 = vector.broadcast %101 : vector<8x1xf32> to vector<8x128xf32>
    %103 = arith.addf %99, %102 : vector<8x128xf32>
    %104 = vector.extract_strided_slice %98 {offsets = [0, 0, 0], sizes = [1, 8, 1], strides = [1, 1, 1]} : vector<8x8x1xf32> to vector<1x8x1xf32>
    %105 = vector.shape_cast %104 : vector<1x8x1xf32> to vector<8x1xf32>
    %106 = vector.extract_strided_slice %96 {offsets = [0, 0], sizes = [1, 128], strides = [1, 1]} : vector<4x128xf32> to vector<1x128xf32>
    %107 = vector.broadcast %105 : vector<8x1xf32> to vector<8x128xf32>
    %108 = vector.broadcast %106 : vector<1x128xf32> to vector<8x128xf32>
    %109 = arith.mulf %107, %108 : vector<8x128xf32>
    %110 = arith.addf %103, %109 : vector<8x128xf32>
    %111 = vector.extract_strided_slice %98 {offsets = [1, 0, 0], sizes = [1, 8, 1], strides = [1, 1, 1]} : vector<8x8x1xf32> to vector<1x8x1xf32>
    %112 = vector.shape_cast %111 : vector<1x8x1xf32> to vector<8x1xf32>
    %113 = vector.extract_strided_slice %96 {offsets = [1, 0], sizes = [1, 128], strides = [1, 1]} : vector<4x128xf32> to vector<1x128xf32>
    %114 = vector.broadcast %112 : vector<8x1xf32> to vector<8x128xf32>
    %115 = vector.broadcast %113 : vector<1x128xf32> to vector<8x128xf32>
    %116 = arith.mulf %114, %115 : vector<8x128xf32>
    %117 = arith.addf %110, %116 : vector<8x128xf32>
    %118 = vector.extract_strided_slice %98 {offsets = [2, 0, 0], sizes = [1, 8, 1], strides = [1, 1, 1]} : vector<8x8x1xf32> to vector<1x8x1xf32>
    %119 = vector.shape_cast %118 : vector<1x8x1xf32> to vector<8x1xf32>
    %120 = vector.extract_strided_slice %96 {offsets = [2, 0], sizes = [1, 128], strides = [1, 1]} : vector<4x128xf32> to vector<1x128xf32>
    %121 = vector.broadcast %119 : vector<8x1xf32> to vector<8x128xf32>
    %122 = vector.broadcast %120 : vector<1x128xf32> to vector<8x128xf32>
    %123 = arith.mulf %121, %122 : vector<8x128xf32>
    %124 = arith.addf %117, %123 : vector<8x128xf32>
    %125 = vector.extract_strided_slice %98 {offsets = [3, 0, 0], sizes = [1, 8, 1], strides = [1, 1, 1]} : vector<8x8x1xf32> to vector<1x8x1xf32>
    %126 = vector.shape_cast %125 : vector<1x8x1xf32> to vector<8x1xf32>
    %127 = vector.extract_strided_slice %96 {offsets = [3, 0], sizes = [1, 128], strides = [1, 1]} : vector<4x128xf32> to vector<1x128xf32>
    %128 = vector.broadcast %126 : vector<8x1xf32> to vector<8x128xf32>
    %129 = vector.broadcast %127 : vector<1x128xf32> to vector<8x128xf32>
    %130 = arith.mulf %128, %129 : vector<8x128xf32>
    %131 = arith.addf %124, %130 : vector<8x128xf32>
    %c127_i32_27 = arith.constant 127 : i32
    %132 = tpu.dynamic_rotate %96 by %c127_i32_27 dim 1 : vector<4x128xf32>, i32 -> vector<4x128xf32>
    %133 = vector.extract_strided_slice %98 {offsets = [4, 0, 0], sizes = [1, 8, 1], strides = [1, 1, 1]} : vector<8x8x1xf32> to vector<1x8x1xf32>
    %134 = vector.shape_cast %133 : vector<1x8x1xf32> to vector<8x1xf32>
    %135 = vector.extract_strided_slice %132 {offsets = [0, 0], sizes = [1, 128], strides = [1, 1]} : vector<4x128xf32> to vector<1x128xf32>
    %136 = vector.broadcast %134 : vector<8x1xf32> to vector<8x128xf32>
    %137 = vector.broadcast %135 : vector<1x128xf32> to vector<8x128xf32>
    %138 = arith.mulf %136, %137 : vector<8x128xf32>
    %139 = arith.addf %131, %138 : vector<8x128xf32>
    %140 = vector.extract_strided_slice %98 {offsets = [5, 0, 0], sizes = [1, 8, 1], strides = [1, 1, 1]} : vector<8x8x1xf32> to vector<1x8x1xf32>
    %141 = vector.shape_cast %140 : vector<1x8x1xf32> to vector<8x1xf32>
    %142 = vector.extract_strided_slice %132 {offsets = [1, 0], sizes = [1, 128], strides = [1, 1]} : vector<4x128xf32> to vector<1x128xf32>
    %143 = vector.broadcast %141 : vector<8x1xf32> to vector<8x128xf32>
    %144 = vector.broadcast %142 : vector<1x128xf32> to vector<8x128xf32>
    %145 = arith.mulf %143, %144 : vector<8x128xf32>
    %146 = arith.addf %139, %145 : vector<8x128xf32>
    %147 = vector.extract_strided_slice %98 {offsets = [6, 0, 0], sizes = [1, 8, 1], strides = [1, 1, 1]} : vector<8x8x1xf32> to vector<1x8x1xf32>
    %148 = vector.shape_cast %147 : vector<1x8x1xf32> to vector<8x1xf32>
    %149 = vector.extract_strided_slice %132 {offsets = [2, 0], sizes = [1, 128], strides = [1, 1]} : vector<4x128xf32> to vector<1x128xf32>
    %150 = vector.broadcast %148 : vector<8x1xf32> to vector<8x128xf32>
    %151 = vector.broadcast %149 : vector<1x128xf32> to vector<8x128xf32>
    %152 = arith.mulf %150, %151 : vector<8x128xf32>
    %153 = arith.addf %146, %152 : vector<8x128xf32>
    %154 = vector.extract_strided_slice %98 {offsets = [7, 0, 0], sizes = [1, 8, 1], strides = [1, 1, 1]} : vector<8x8x1xf32> to vector<1x8x1xf32>
    %155 = vector.shape_cast %154 : vector<1x8x1xf32> to vector<8x1xf32>
    %156 = vector.extract_strided_slice %132 {offsets = [3, 0], sizes = [1, 128], strides = [1, 1]} : vector<4x128xf32> to vector<1x128xf32>
    %157 = vector.broadcast %155 : vector<8x1xf32> to vector<8x128xf32>
    %158 = vector.broadcast %156 : vector<1x128xf32> to vector<8x128xf32>
    %159 = arith.mulf %157, %158 : vector<8x128xf32>
    %160 = arith.addf %153, %159 : vector<8x128xf32>
    %161 = vector.extract_strided_slice %160 {offsets = [0, 0], sizes = [4, 128], strides = [1, 1]} : vector<8x128xf32> to vector<4x128xf32>
    %162 = vector.extract_strided_slice %160 {offsets = [4, 0], sizes = [4, 128], strides = [1, 1]} : vector<8x128xf32> to vector<4x128xf32>
    %cst_28 = arith.constant 0.000000e+00 : f32
    %163 = vector.broadcast %cst_28 : f32 to vector<4x128xf32>
    %164 = arith.subf %163, %162 : vector<4x128xf32>
    %165 = math.exp %164 : vector<4x128xf32>
    %cst_29 = arith.constant 1.000000e+00 : f32
    %166 = vector.broadcast %cst_29 : f32 to vector<4x128xf32>
    %167 = arith.addf %166, %165 : vector<4x128xf32>
    %cst_30 = arith.constant 1.000000e+00 : f32
    %168 = vector.broadcast %cst_30 : f32 to vector<4x128xf32>
    %169 = arith.divf %168, %167 : vector<4x128xf32>
    %170 = arith.mulf %161, %169 : vector<4x128xf32>
    %171 = arith.addf %90, %170 : vector<4x128xf32>
    %c127_i32_31 = arith.constant 127 : i32
    %172 = tpu.dynamic_rotate %96 by %c127_i32_31 dim 1 : vector<4x128xf32>, i32 -> vector<4x128xf32>
    %173 = arith.addf %172, %170 : vector<4x128xf32>
    %c14_i32 = arith.constant 14 : i32
    %174 = vector.broadcast %c14_i32 : i32 to vector<4x128xi32>
    %175 = arith.cmpi slt, %0, %174 : vector<4x128xi32>
    %cst_32 = arith.constant 0.000000e+00 : f32
    %176 = vector.broadcast %cst_32 : f32 to vector<4x128xf32>
    %177 = arith.select %175, %173, %176 : vector<4x128xi1>, vector<4x128xf32>
    %c2 = arith.constant 2 : index
    %c0_33 = arith.constant 0 : index
    %c0_34 = arith.constant 0 : index
    %c0_35 = arith.constant 0 : index
    %178 = vector.load %arg4[%c2, %c0_33, %c0_34, %c0_35] : memref<6x8x8x1xf32, #tpu.memory_space<vmem>>, vector<1x8x8x1xf32>
    %179 = vector.shape_cast %178 : vector<1x8x8x1xf32> to vector<8x8x1xf32>
    %cst_36 = arith.constant 0.000000e+00 : f32
    %180 = vector.broadcast %cst_36 : f32 to vector<8x128xf32>
    %c2_37 = arith.constant 2 : index
    %c0_38 = arith.constant 0 : index
    %c0_39 = arith.constant 0 : index
    %181 = vector.load %arg5[%c2_37, %c0_38, %c0_39] : memref<6x8x1xf32, #tpu.memory_space<vmem>>, vector<1x8x1xf32>
    %182 = vector.shape_cast %181 : vector<1x8x1xf32> to vector<8x1xf32>
    %183 = vector.broadcast %182 : vector<8x1xf32> to vector<8x128xf32>
    %184 = arith.addf %180, %183 : vector<8x128xf32>
    %185 = vector.extract_strided_slice %179 {offsets = [0, 0, 0], sizes = [1, 8, 1], strides = [1, 1, 1]} : vector<8x8x1xf32> to vector<1x8x1xf32>
    %186 = vector.shape_cast %185 : vector<1x8x1xf32> to vector<8x1xf32>
    %187 = vector.extract_strided_slice %177 {offsets = [0, 0], sizes = [1, 128], strides = [1, 1]} : vector<4x128xf32> to vector<1x128xf32>
    %188 = vector.broadcast %186 : vector<8x1xf32> to vector<8x128xf32>
    %189 = vector.broadcast %187 : vector<1x128xf32> to vector<8x128xf32>
    %190 = arith.mulf %188, %189 : vector<8x128xf32>
    %191 = arith.addf %184, %190 : vector<8x128xf32>
    %192 = vector.extract_strided_slice %179 {offsets = [1, 0, 0], sizes = [1, 8, 1], strides = [1, 1, 1]} : vector<8x8x1xf32> to vector<1x8x1xf32>
    %193 = vector.shape_cast %192 : vector<1x8x1xf32> to vector<8x1xf32>
    %194 = vector.extract_strided_slice %177 {offsets = [1, 0], sizes = [1, 128], strides = [1, 1]} : vector<4x128xf32> to vector<1x128xf32>
    %195 = vector.broadcast %193 : vector<8x1xf32> to vector<8x128xf32>
    %196 = vector.broadcast %194 : vector<1x128xf32> to vector<8x128xf32>
    %197 = arith.mulf %195, %196 : vector<8x128xf32>
    %198 = arith.addf %191, %197 : vector<8x128xf32>
    %199 = vector.extract_strided_slice %179 {offsets = [2, 0, 0], sizes = [1, 8, 1], strides = [1, 1, 1]} : vector<8x8x1xf32> to vector<1x8x1xf32>
    %200 = vector.shape_cast %199 : vector<1x8x1xf32> to vector<8x1xf32>
    %201 = vector.extract_strided_slice %177 {offsets = [2, 0], sizes = [1, 128], strides = [1, 1]} : vector<4x128xf32> to vector<1x128xf32>
    %202 = vector.broadcast %200 : vector<8x1xf32> to vector<8x128xf32>
    %203 = vector.broadcast %201 : vector<1x128xf32> to vector<8x128xf32>
    %204 = arith.mulf %202, %203 : vector<8x128xf32>
    %205 = arith.addf %198, %204 : vector<8x128xf32>
    %206 = vector.extract_strided_slice %179 {offsets = [3, 0, 0], sizes = [1, 8, 1], strides = [1, 1, 1]} : vector<8x8x1xf32> to vector<1x8x1xf32>
    %207 = vector.shape_cast %206 : vector<1x8x1xf32> to vector<8x1xf32>
    %208 = vector.extract_strided_slice %177 {offsets = [3, 0], sizes = [1, 128], strides = [1, 1]} : vector<4x128xf32> to vector<1x128xf32>
    %209 = vector.broadcast %207 : vector<8x1xf32> to vector<8x128xf32>
    %210 = vector.broadcast %208 : vector<1x128xf32> to vector<8x128xf32>
    %211 = arith.mulf %209, %210 : vector<8x128xf32>
    %212 = arith.addf %205, %211 : vector<8x128xf32>
    %c127_i32_40 = arith.constant 127 : i32
    %213 = tpu.dynamic_rotate %177 by %c127_i32_40 dim 1 : vector<4x128xf32>, i32 -> vector<4x128xf32>
    %214 = vector.extract_strided_slice %179 {offsets = [4, 0, 0], sizes = [1, 8, 1], strides = [1, 1, 1]} : vector<8x8x1xf32> to vector<1x8x1xf32>
    %215 = vector.shape_cast %214 : vector<1x8x1xf32> to vector<8x1xf32>
    %216 = vector.extract_strided_slice %213 {offsets = [0, 0], sizes = [1, 128], strides = [1, 1]} : vector<4x128xf32> to vector<1x128xf32>
    %217 = vector.broadcast %215 : vector<8x1xf32> to vector<8x128xf32>
    %218 = vector.broadcast %216 : vector<1x128xf32> to vector<8x128xf32>
    %219 = arith.mulf %217, %218 : vector<8x128xf32>
    %220 = arith.addf %212, %219 : vector<8x128xf32>
    %221 = vector.extract_strided_slice %179 {offsets = [5, 0, 0], sizes = [1, 8, 1], strides = [1, 1, 1]} : vector<8x8x1xf32> to vector<1x8x1xf32>
    %222 = vector.shape_cast %221 : vector<1x8x1xf32> to vector<8x1xf32>
    %223 = vector.extract_strided_slice %213 {offsets = [1, 0], sizes = [1, 128], strides = [1, 1]} : vector<4x128xf32> to vector<1x128xf32>
    %224 = vector.broadcast %222 : vector<8x1xf32> to vector<8x128xf32>
    %225 = vector.broadcast %223 : vector<1x128xf32> to vector<8x128xf32>
    %226 = arith.mulf %224, %225 : vector<8x128xf32>
    %227 = arith.addf %220, %226 : vector<8x128xf32>
    %228 = vector.extract_strided_slice %179 {offsets = [6, 0, 0], sizes = [1, 8, 1], strides = [1, 1, 1]} : vector<8x8x1xf32> to vector<1x8x1xf32>
    %229 = vector.shape_cast %228 : vector<1x8x1xf32> to vector<8x1xf32>
    %230 = vector.extract_strided_slice %213 {offsets = [2, 0], sizes = [1, 128], strides = [1, 1]} : vector<4x128xf32> to vector<1x128xf32>
    %231 = vector.broadcast %229 : vector<8x1xf32> to vector<8x128xf32>
    %232 = vector.broadcast %230 : vector<1x128xf32> to vector<8x128xf32>
    %233 = arith.mulf %231, %232 : vector<8x128xf32>
    %234 = arith.addf %227, %233 : vector<8x128xf32>
    %235 = vector.extract_strided_slice %179 {offsets = [7, 0, 0], sizes = [1, 8, 1], strides = [1, 1, 1]} : vector<8x8x1xf32> to vector<1x8x1xf32>
    %236 = vector.shape_cast %235 : vector<1x8x1xf32> to vector<8x1xf32>
    %237 = vector.extract_strided_slice %213 {offsets = [3, 0], sizes = [1, 128], strides = [1, 1]} : vector<4x128xf32> to vector<1x128xf32>
    %238 = vector.broadcast %236 : vector<8x1xf32> to vector<8x128xf32>
    %239 = vector.broadcast %237 : vector<1x128xf32> to vector<8x128xf32>
    %240 = arith.mulf %238, %239 : vector<8x128xf32>
    %241 = arith.addf %234, %240 : vector<8x128xf32>
    %242 = vector.extract_strided_slice %241 {offsets = [0, 0], sizes = [4, 128], strides = [1, 1]} : vector<8x128xf32> to vector<4x128xf32>
    %243 = vector.extract_strided_slice %241 {offsets = [4, 0], sizes = [4, 128], strides = [1, 1]} : vector<8x128xf32> to vector<4x128xf32>
    %cst_41 = arith.constant 0.000000e+00 : f32
    %244 = vector.broadcast %cst_41 : f32 to vector<4x128xf32>
    %245 = arith.subf %244, %243 : vector<4x128xf32>
    %246 = math.exp %245 : vector<4x128xf32>
    %cst_42 = arith.constant 1.000000e+00 : f32
    %247 = vector.broadcast %cst_42 : f32 to vector<4x128xf32>
    %248 = arith.addf %247, %246 : vector<4x128xf32>
    %cst_43 = arith.constant 1.000000e+00 : f32
    %249 = vector.broadcast %cst_43 : f32 to vector<4x128xf32>
    %250 = arith.divf %249, %248 : vector<4x128xf32>
    %251 = arith.mulf %242, %250 : vector<4x128xf32>
    %252 = arith.addf %171, %251 : vector<4x128xf32>
    %c127_i32_44 = arith.constant 127 : i32
    %253 = tpu.dynamic_rotate %177 by %c127_i32_44 dim 1 : vector<4x128xf32>, i32 -> vector<4x128xf32>
    %254 = arith.addf %253, %251 : vector<4x128xf32>
    %c13_i32 = arith.constant 13 : i32
    %255 = vector.broadcast %c13_i32 : i32 to vector<4x128xi32>
    %256 = arith.cmpi slt, %0, %255 : vector<4x128xi32>
    %cst_45 = arith.constant 0.000000e+00 : f32
    %257 = vector.broadcast %cst_45 : f32 to vector<4x128xf32>
    %258 = arith.select %256, %254, %257 : vector<4x128xi1>, vector<4x128xf32>
    %c3 = arith.constant 3 : index
    %c0_46 = arith.constant 0 : index
    %c0_47 = arith.constant 0 : index
    %c0_48 = arith.constant 0 : index
    %259 = vector.load %arg4[%c3, %c0_46, %c0_47, %c0_48] : memref<6x8x8x1xf32, #tpu.memory_space<vmem>>, vector<1x8x8x1xf32>
    %260 = vector.shape_cast %259 : vector<1x8x8x1xf32> to vector<8x8x1xf32>
    %cst_49 = arith.constant 0.000000e+00 : f32
    %261 = vector.broadcast %cst_49 : f32 to vector<8x128xf32>
    %c3_50 = arith.constant 3 : index
    %c0_51 = arith.constant 0 : index
    %c0_52 = arith.constant 0 : index
    %262 = vector.load %arg5[%c3_50, %c0_51, %c0_52] : memref<6x8x1xf32, #tpu.memory_space<vmem>>, vector<1x8x1xf32>
    %263 = vector.shape_cast %262 : vector<1x8x1xf32> to vector<8x1xf32>
    %264 = vector.broadcast %263 : vector<8x1xf32> to vector<8x128xf32>
    %265 = arith.addf %261, %264 : vector<8x128xf32>
    %c1_i32 = arith.constant 1 : i32
    %266 = tpu.dynamic_rotate %258 by %c1_i32 dim 1 : vector<4x128xf32>, i32 -> vector<4x128xf32>
    %267 = vector.extract_strided_slice %260 {offsets = [0, 0, 0], sizes = [1, 8, 1], strides = [1, 1, 1]} : vector<8x8x1xf32> to vector<1x8x1xf32>
    %268 = vector.shape_cast %267 : vector<1x8x1xf32> to vector<8x1xf32>
    %269 = vector.extract_strided_slice %266 {offsets = [0, 0], sizes = [1, 128], strides = [1, 1]} : vector<4x128xf32> to vector<1x128xf32>
    %270 = vector.broadcast %268 : vector<8x1xf32> to vector<8x128xf32>
    %271 = vector.broadcast %269 : vector<1x128xf32> to vector<8x128xf32>
    %272 = arith.mulf %270, %271 : vector<8x128xf32>
    %273 = arith.addf %265, %272 : vector<8x128xf32>
    %274 = vector.extract_strided_slice %260 {offsets = [1, 0, 0], sizes = [1, 8, 1], strides = [1, 1, 1]} : vector<8x8x1xf32> to vector<1x8x1xf32>
    %275 = vector.shape_cast %274 : vector<1x8x1xf32> to vector<8x1xf32>
    %276 = vector.extract_strided_slice %266 {offsets = [1, 0], sizes = [1, 128], strides = [1, 1]} : vector<4x128xf32> to vector<1x128xf32>
    %277 = vector.broadcast %275 : vector<8x1xf32> to vector<8x128xf32>
    %278 = vector.broadcast %276 : vector<1x128xf32> to vector<8x128xf32>
    %279 = arith.mulf %277, %278 : vector<8x128xf32>
    %280 = arith.addf %273, %279 : vector<8x128xf32>
    %281 = vector.extract_strided_slice %260 {offsets = [2, 0, 0], sizes = [1, 8, 1], strides = [1, 1, 1]} : vector<8x8x1xf32> to vector<1x8x1xf32>
    %282 = vector.shape_cast %281 : vector<1x8x1xf32> to vector<8x1xf32>
    %283 = vector.extract_strided_slice %266 {offsets = [2, 0], sizes = [1, 128], strides = [1, 1]} : vector<4x128xf32> to vector<1x128xf32>
    %284 = vector.broadcast %282 : vector<8x1xf32> to vector<8x128xf32>
    %285 = vector.broadcast %283 : vector<1x128xf32> to vector<8x128xf32>
    %286 = arith.mulf %284, %285 : vector<8x128xf32>
    %287 = arith.addf %280, %286 : vector<8x128xf32>
    %288 = vector.extract_strided_slice %260 {offsets = [3, 0, 0], sizes = [1, 8, 1], strides = [1, 1, 1]} : vector<8x8x1xf32> to vector<1x8x1xf32>
    %289 = vector.shape_cast %288 : vector<1x8x1xf32> to vector<8x1xf32>
    %290 = vector.extract_strided_slice %266 {offsets = [3, 0], sizes = [1, 128], strides = [1, 1]} : vector<4x128xf32> to vector<1x128xf32>
    %291 = vector.broadcast %289 : vector<8x1xf32> to vector<8x128xf32>
    %292 = vector.broadcast %290 : vector<1x128xf32> to vector<8x128xf32>
    %293 = arith.mulf %291, %292 : vector<8x128xf32>
    %294 = arith.addf %287, %293 : vector<8x128xf32>
    %c127_i32_53 = arith.constant 127 : i32
    %295 = tpu.dynamic_rotate %258 by %c127_i32_53 dim 1 : vector<4x128xf32>, i32 -> vector<4x128xf32>
    %296 = vector.extract_strided_slice %260 {offsets = [4, 0, 0], sizes = [1, 8, 1], strides = [1, 1, 1]} : vector<8x8x1xf32> to vector<1x8x1xf32>
    %297 = vector.shape_cast %296 : vector<1x8x1xf32> to vector<8x1xf32>
    %298 = vector.extract_strided_slice %295 {offsets = [0, 0], sizes = [1, 128], strides = [1, 1]} : vector<4x128xf32> to vector<1x128xf32>
    %299 = vector.broadcast %297 : vector<8x1xf32> to vector<8x128xf32>
    %300 = vector.broadcast %298 : vector<1x128xf32> to vector<8x128xf32>
    %301 = arith.mulf %299, %300 : vector<8x128xf32>
    %302 = arith.addf %294, %301 : vector<8x128xf32>
    %303 = vector.extract_strided_slice %260 {offsets = [5, 0, 0], sizes = [1, 8, 1], strides = [1, 1, 1]} : vector<8x8x1xf32> to vector<1x8x1xf32>
    %304 = vector.shape_cast %303 : vector<1x8x1xf32> to vector<8x1xf32>
    %305 = vector.extract_strided_slice %295 {offsets = [1, 0], sizes = [1, 128], strides = [1, 1]} : vector<4x128xf32> to vector<1x128xf32>
    %306 = vector.broadcast %304 : vector<8x1xf32> to vector<8x128xf32>
    %307 = vector.broadcast %305 : vector<1x128xf32> to vector<8x128xf32>
    %308 = arith.mulf %306, %307 : vector<8x128xf32>
    %309 = arith.addf %302, %308 : vector<8x128xf32>
    %310 = vector.extract_strided_slice %260 {offsets = [6, 0, 0], sizes = [1, 8, 1], strides = [1, 1, 1]} : vector<8x8x1xf32> to vector<1x8x1xf32>
    %311 = vector.shape_cast %310 : vector<1x8x1xf32> to vector<8x1xf32>
    %312 = vector.extract_strided_slice %295 {offsets = [2, 0], sizes = [1, 128], strides = [1, 1]} : vector<4x128xf32> to vector<1x128xf32>
    %313 = vector.broadcast %311 : vector<8x1xf32> to vector<8x128xf32>
    %314 = vector.broadcast %312 : vector<1x128xf32> to vector<8x128xf32>
    %315 = arith.mulf %313, %314 : vector<8x128xf32>
    %316 = arith.addf %309, %315 : vector<8x128xf32>
    %317 = vector.extract_strided_slice %260 {offsets = [7, 0, 0], sizes = [1, 8, 1], strides = [1, 1, 1]} : vector<8x8x1xf32> to vector<1x8x1xf32>
    %318 = vector.shape_cast %317 : vector<1x8x1xf32> to vector<8x1xf32>
    %319 = vector.extract_strided_slice %295 {offsets = [3, 0], sizes = [1, 128], strides = [1, 1]} : vector<4x128xf32> to vector<1x128xf32>
    %320 = vector.broadcast %318 : vector<8x1xf32> to vector<8x128xf32>
    %321 = vector.broadcast %319 : vector<1x128xf32> to vector<8x128xf32>
    %322 = arith.mulf %320, %321 : vector<8x128xf32>
    %323 = arith.addf %316, %322 : vector<8x128xf32>
    %324 = vector.extract_strided_slice %323 {offsets = [0, 0], sizes = [4, 128], strides = [1, 1]} : vector<8x128xf32> to vector<4x128xf32>
    %325 = vector.extract_strided_slice %323 {offsets = [4, 0], sizes = [4, 128], strides = [1, 1]} : vector<8x128xf32> to vector<4x128xf32>
    %cst_54 = arith.constant 0.000000e+00 : f32
    %326 = vector.broadcast %cst_54 : f32 to vector<4x128xf32>
    %327 = arith.subf %326, %325 : vector<4x128xf32>
    %328 = math.exp %327 : vector<4x128xf32>
    %cst_55 = arith.constant 1.000000e+00 : f32
    %329 = vector.broadcast %cst_55 : f32 to vector<4x128xf32>
    %330 = arith.addf %329, %328 : vector<4x128xf32>
    %cst_56 = arith.constant 1.000000e+00 : f32
    %331 = vector.broadcast %cst_56 : f32 to vector<4x128xf32>
    %332 = arith.divf %331, %330 : vector<4x128xf32>
    %333 = arith.mulf %324, %332 : vector<4x128xf32>
    %334 = arith.addf %252, %333 : vector<4x128xf32>
    %335 = arith.addf %258, %333 : vector<4x128xf32>
    %c13_i32_57 = arith.constant 13 : i32
    %336 = vector.broadcast %c13_i32_57 : i32 to vector<4x128xi32>
    %337 = arith.cmpi slt, %0, %336 : vector<4x128xi32>
    %cst_58 = arith.constant 0.000000e+00 : f32
    %338 = vector.broadcast %cst_58 : f32 to vector<4x128xf32>
    %339 = arith.select %337, %335, %338 : vector<4x128xi1>, vector<4x128xf32>
    %c4 = arith.constant 4 : index
    %c0_59 = arith.constant 0 : index
    %c0_60 = arith.constant 0 : index
    %c0_61 = arith.constant 0 : index
    %340 = vector.load %arg4[%c4, %c0_59, %c0_60, %c0_61] : memref<6x8x8x1xf32, #tpu.memory_space<vmem>>, vector<1x8x8x1xf32>
    %341 = vector.shape_cast %340 : vector<1x8x8x1xf32> to vector<8x8x1xf32>
    %cst_62 = arith.constant 0.000000e+00 : f32
    %342 = vector.broadcast %cst_62 : f32 to vector<8x128xf32>
    %c4_63 = arith.constant 4 : index
    %c0_64 = arith.constant 0 : index
    %c0_65 = arith.constant 0 : index
    %343 = vector.load %arg5[%c4_63, %c0_64, %c0_65] : memref<6x8x1xf32, #tpu.memory_space<vmem>>, vector<1x8x1xf32>
    %344 = vector.shape_cast %343 : vector<1x8x1xf32> to vector<8x1xf32>
    %345 = vector.broadcast %344 : vector<8x1xf32> to vector<8x128xf32>
    %346 = arith.addf %342, %345 : vector<8x128xf32>
    %c1_i32_66 = arith.constant 1 : i32
    %347 = tpu.dynamic_rotate %339 by %c1_i32_66 dim 1 : vector<4x128xf32>, i32 -> vector<4x128xf32>
    %348 = vector.extract_strided_slice %341 {offsets = [0, 0, 0], sizes = [1, 8, 1], strides = [1, 1, 1]} : vector<8x8x1xf32> to vector<1x8x1xf32>
    %349 = vector.shape_cast %348 : vector<1x8x1xf32> to vector<8x1xf32>
    %350 = vector.extract_strided_slice %347 {offsets = [0, 0], sizes = [1, 128], strides = [1, 1]} : vector<4x128xf32> to vector<1x128xf32>
    %351 = vector.broadcast %349 : vector<8x1xf32> to vector<8x128xf32>
    %352 = vector.broadcast %350 : vector<1x128xf32> to vector<8x128xf32>
    %353 = arith.mulf %351, %352 : vector<8x128xf32>
    %354 = arith.addf %346, %353 : vector<8x128xf32>
    %355 = vector.extract_strided_slice %341 {offsets = [1, 0, 0], sizes = [1, 8, 1], strides = [1, 1, 1]} : vector<8x8x1xf32> to vector<1x8x1xf32>
    %356 = vector.shape_cast %355 : vector<1x8x1xf32> to vector<8x1xf32>
    %357 = vector.extract_strided_slice %347 {offsets = [1, 0], sizes = [1, 128], strides = [1, 1]} : vector<4x128xf32> to vector<1x128xf32>
    %358 = vector.broadcast %356 : vector<8x1xf32> to vector<8x128xf32>
    %359 = vector.broadcast %357 : vector<1x128xf32> to vector<8x128xf32>
    %360 = arith.mulf %358, %359 : vector<8x128xf32>
    %361 = arith.addf %354, %360 : vector<8x128xf32>
    %362 = vector.extract_strided_slice %341 {offsets = [2, 0, 0], sizes = [1, 8, 1], strides = [1, 1, 1]} : vector<8x8x1xf32> to vector<1x8x1xf32>
    %363 = vector.shape_cast %362 : vector<1x8x1xf32> to vector<8x1xf32>
    %364 = vector.extract_strided_slice %347 {offsets = [2, 0], sizes = [1, 128], strides = [1, 1]} : vector<4x128xf32> to vector<1x128xf32>
    %365 = vector.broadcast %363 : vector<8x1xf32> to vector<8x128xf32>
    %366 = vector.broadcast %364 : vector<1x128xf32> to vector<8x128xf32>
    %367 = arith.mulf %365, %366 : vector<8x128xf32>
    %368 = arith.addf %361, %367 : vector<8x128xf32>
    %369 = vector.extract_strided_slice %341 {offsets = [3, 0, 0], sizes = [1, 8, 1], strides = [1, 1, 1]} : vector<8x8x1xf32> to vector<1x8x1xf32>
    %370 = vector.shape_cast %369 : vector<1x8x1xf32> to vector<8x1xf32>
    %371 = vector.extract_strided_slice %347 {offsets = [3, 0], sizes = [1, 128], strides = [1, 1]} : vector<4x128xf32> to vector<1x128xf32>
    %372 = vector.broadcast %370 : vector<8x1xf32> to vector<8x128xf32>
    %373 = vector.broadcast %371 : vector<1x128xf32> to vector<8x128xf32>
    %374 = arith.mulf %372, %373 : vector<8x128xf32>
    %375 = arith.addf %368, %374 : vector<8x128xf32>
    %c127_i32_67 = arith.constant 127 : i32
    %376 = tpu.dynamic_rotate %339 by %c127_i32_67 dim 1 : vector<4x128xf32>, i32 -> vector<4x128xf32>
    %377 = vector.extract_strided_slice %341 {offsets = [4, 0, 0], sizes = [1, 8, 1], strides = [1, 1, 1]} : vector<8x8x1xf32> to vector<1x8x1xf32>
    %378 = vector.shape_cast %377 : vector<1x8x1xf32> to vector<8x1xf32>
    %379 = vector.extract_strided_slice %376 {offsets = [0, 0], sizes = [1, 128], strides = [1, 1]} : vector<4x128xf32> to vector<1x128xf32>
    %380 = vector.broadcast %378 : vector<8x1xf32> to vector<8x128xf32>
    %381 = vector.broadcast %379 : vector<1x128xf32> to vector<8x128xf32>
    %382 = arith.mulf %380, %381 : vector<8x128xf32>
    %383 = arith.addf %375, %382 : vector<8x128xf32>
    %384 = vector.extract_strided_slice %341 {offsets = [5, 0, 0], sizes = [1, 8, 1], strides = [1, 1, 1]} : vector<8x8x1xf32> to vector<1x8x1xf32>
    %385 = vector.shape_cast %384 : vector<1x8x1xf32> to vector<8x1xf32>
    %386 = vector.extract_strided_slice %376 {offsets = [1, 0], sizes = [1, 128], strides = [1, 1]} : vector<4x128xf32> to vector<1x128xf32>
    %387 = vector.broadcast %385 : vector<8x1xf32> to vector<8x128xf32>
    %388 = vector.broadcast %386 : vector<1x128xf32> to vector<8x128xf32>
    %389 = arith.mulf %387, %388 : vector<8x128xf32>
    %390 = arith.addf %383, %389 : vector<8x128xf32>
    %391 = vector.extract_strided_slice %341 {offsets = [6, 0, 0], sizes = [1, 8, 1], strides = [1, 1, 1]} : vector<8x8x1xf32> to vector<1x8x1xf32>
    %392 = vector.shape_cast %391 : vector<1x8x1xf32> to vector<8x1xf32>
    %393 = vector.extract_strided_slice %376 {offsets = [2, 0], sizes = [1, 128], strides = [1, 1]} : vector<4x128xf32> to vector<1x128xf32>
    %394 = vector.broadcast %392 : vector<8x1xf32> to vector<8x128xf32>
    %395 = vector.broadcast %393 : vector<1x128xf32> to vector<8x128xf32>
    %396 = arith.mulf %394, %395 : vector<8x128xf32>
    %397 = arith.addf %390, %396 : vector<8x128xf32>
    %398 = vector.extract_strided_slice %341 {offsets = [7, 0, 0], sizes = [1, 8, 1], strides = [1, 1, 1]} : vector<8x8x1xf32> to vector<1x8x1xf32>
    %399 = vector.shape_cast %398 : vector<1x8x1xf32> to vector<8x1xf32>
    %400 = vector.extract_strided_slice %376 {offsets = [3, 0], sizes = [1, 128], strides = [1, 1]} : vector<4x128xf32> to vector<1x128xf32>
    %401 = vector.broadcast %399 : vector<8x1xf32> to vector<8x128xf32>
    %402 = vector.broadcast %400 : vector<1x128xf32> to vector<8x128xf32>
    %403 = arith.mulf %401, %402 : vector<8x128xf32>
    %404 = arith.addf %397, %403 : vector<8x128xf32>
    %405 = vector.extract_strided_slice %404 {offsets = [0, 0], sizes = [4, 128], strides = [1, 1]} : vector<8x128xf32> to vector<4x128xf32>
    %406 = vector.extract_strided_slice %404 {offsets = [4, 0], sizes = [4, 128], strides = [1, 1]} : vector<8x128xf32> to vector<4x128xf32>
    %cst_68 = arith.constant 0.000000e+00 : f32
    %407 = vector.broadcast %cst_68 : f32 to vector<4x128xf32>
    %408 = arith.subf %407, %406 : vector<4x128xf32>
    %409 = math.exp %408 : vector<4x128xf32>
    %cst_69 = arith.constant 1.000000e+00 : f32
    %410 = vector.broadcast %cst_69 : f32 to vector<4x128xf32>
    %411 = arith.addf %410, %409 : vector<4x128xf32>
    %cst_70 = arith.constant 1.000000e+00 : f32
    %412 = vector.broadcast %cst_70 : f32 to vector<4x128xf32>
    %413 = arith.divf %412, %411 : vector<4x128xf32>
    %414 = arith.mulf %405, %413 : vector<4x128xf32>
    %415 = arith.addf %334, %414 : vector<4x128xf32>
    %416 = arith.addf %339, %414 : vector<4x128xf32>
    %c13_i32_71 = arith.constant 13 : i32
    %417 = vector.broadcast %c13_i32_71 : i32 to vector<4x128xi32>
    %418 = arith.cmpi slt, %0, %417 : vector<4x128xi32>
    %cst_72 = arith.constant 0.000000e+00 : f32
    %419 = vector.broadcast %cst_72 : f32 to vector<4x128xf32>
    %420 = arith.select %418, %416, %419 : vector<4x128xi1>, vector<4x128xf32>
    %c5 = arith.constant 5 : index
    %c0_73 = arith.constant 0 : index
    %c0_74 = arith.constant 0 : index
    %c0_75 = arith.constant 0 : index
    %421 = vector.load %arg4[%c5, %c0_73, %c0_74, %c0_75] : memref<6x8x8x1xf32, #tpu.memory_space<vmem>>, vector<1x8x8x1xf32>
    %422 = vector.shape_cast %421 : vector<1x8x8x1xf32> to vector<8x8x1xf32>
    %cst_76 = arith.constant 0.000000e+00 : f32
    %423 = vector.broadcast %cst_76 : f32 to vector<8x128xf32>
    %c5_77 = arith.constant 5 : index
    %c0_78 = arith.constant 0 : index
    %c0_79 = arith.constant 0 : index
    %424 = vector.load %arg5[%c5_77, %c0_78, %c0_79] : memref<6x8x1xf32, #tpu.memory_space<vmem>>, vector<1x8x1xf32>
    %425 = vector.shape_cast %424 : vector<1x8x1xf32> to vector<8x1xf32>
    %426 = vector.broadcast %425 : vector<8x1xf32> to vector<8x128xf32>
    %427 = arith.addf %423, %426 : vector<8x128xf32>
    %c1_i32_80 = arith.constant 1 : i32
    %428 = tpu.dynamic_rotate %420 by %c1_i32_80 dim 1 : vector<4x128xf32>, i32 -> vector<4x128xf32>
    %429 = vector.extract_strided_slice %422 {offsets = [0, 0, 0], sizes = [1, 8, 1], strides = [1, 1, 1]} : vector<8x8x1xf32> to vector<1x8x1xf32>
    %430 = vector.shape_cast %429 : vector<1x8x1xf32> to vector<8x1xf32>
    %431 = vector.extract_strided_slice %428 {offsets = [0, 0], sizes = [1, 128], strides = [1, 1]} : vector<4x128xf32> to vector<1x128xf32>
    %432 = vector.broadcast %430 : vector<8x1xf32> to vector<8x128xf32>
    %433 = vector.broadcast %431 : vector<1x128xf32> to vector<8x128xf32>
    %434 = arith.mulf %432, %433 : vector<8x128xf32>
    %435 = arith.addf %427, %434 : vector<8x128xf32>
    %436 = vector.extract_strided_slice %422 {offsets = [1, 0, 0], sizes = [1, 8, 1], strides = [1, 1, 1]} : vector<8x8x1xf32> to vector<1x8x1xf32>
    %437 = vector.shape_cast %436 : vector<1x8x1xf32> to vector<8x1xf32>
    %438 = vector.extract_strided_slice %428 {offsets = [1, 0], sizes = [1, 128], strides = [1, 1]} : vector<4x128xf32> to vector<1x128xf32>
    %439 = vector.broadcast %437 : vector<8x1xf32> to vector<8x128xf32>
    %440 = vector.broadcast %438 : vector<1x128xf32> to vector<8x128xf32>
    %441 = arith.mulf %439, %440 : vector<8x128xf32>
    %442 = arith.addf %435, %441 : vector<8x128xf32>
    %443 = vector.extract_strided_slice %422 {offsets = [2, 0, 0], sizes = [1, 8, 1], strides = [1, 1, 1]} : vector<8x8x1xf32> to vector<1x8x1xf32>
    %444 = vector.shape_cast %443 : vector<1x8x1xf32> to vector<8x1xf32>
    %445 = vector.extract_strided_slice %428 {offsets = [2, 0], sizes = [1, 128], strides = [1, 1]} : vector<4x128xf32> to vector<1x128xf32>
    %446 = vector.broadcast %444 : vector<8x1xf32> to vector<8x128xf32>
    %447 = vector.broadcast %445 : vector<1x128xf32> to vector<8x128xf32>
    %448 = arith.mulf %446, %447 : vector<8x128xf32>
    %449 = arith.addf %442, %448 : vector<8x128xf32>
    %450 = vector.extract_strided_slice %422 {offsets = [3, 0, 0], sizes = [1, 8, 1], strides = [1, 1, 1]} : vector<8x8x1xf32> to vector<1x8x1xf32>
    %451 = vector.shape_cast %450 : vector<1x8x1xf32> to vector<8x1xf32>
    %452 = vector.extract_strided_slice %428 {offsets = [3, 0], sizes = [1, 128], strides = [1, 1]} : vector<4x128xf32> to vector<1x128xf32>
    %453 = vector.broadcast %451 : vector<8x1xf32> to vector<8x128xf32>
    %454 = vector.broadcast %452 : vector<1x128xf32> to vector<8x128xf32>
    %455 = arith.mulf %453, %454 : vector<8x128xf32>
    %456 = arith.addf %449, %455 : vector<8x128xf32>
    %c127_i32_81 = arith.constant 127 : i32
    %457 = tpu.dynamic_rotate %420 by %c127_i32_81 dim 1 : vector<4x128xf32>, i32 -> vector<4x128xf32>
    %458 = vector.extract_strided_slice %422 {offsets = [4, 0, 0], sizes = [1, 8, 1], strides = [1, 1, 1]} : vector<8x8x1xf32> to vector<1x8x1xf32>
    %459 = vector.shape_cast %458 : vector<1x8x1xf32> to vector<8x1xf32>
    %460 = vector.extract_strided_slice %457 {offsets = [0, 0], sizes = [1, 128], strides = [1, 1]} : vector<4x128xf32> to vector<1x128xf32>
    %461 = vector.broadcast %459 : vector<8x1xf32> to vector<8x128xf32>
    %462 = vector.broadcast %460 : vector<1x128xf32> to vector<8x128xf32>
    %463 = arith.mulf %461, %462 : vector<8x128xf32>
    %464 = arith.addf %456, %463 : vector<8x128xf32>
    %465 = vector.extract_strided_slice %422 {offsets = [5, 0, 0], sizes = [1, 8, 1], strides = [1, 1, 1]} : vector<8x8x1xf32> to vector<1x8x1xf32>
    %466 = vector.shape_cast %465 : vector<1x8x1xf32> to vector<8x1xf32>
    %467 = vector.extract_strided_slice %457 {offsets = [1, 0], sizes = [1, 128], strides = [1, 1]} : vector<4x128xf32> to vector<1x128xf32>
    %468 = vector.broadcast %466 : vector<8x1xf32> to vector<8x128xf32>
    %469 = vector.broadcast %467 : vector<1x128xf32> to vector<8x128xf32>
    %470 = arith.mulf %468, %469 : vector<8x128xf32>
    %471 = arith.addf %464, %470 : vector<8x128xf32>
    %472 = vector.extract_strided_slice %422 {offsets = [6, 0, 0], sizes = [1, 8, 1], strides = [1, 1, 1]} : vector<8x8x1xf32> to vector<1x8x1xf32>
    %473 = vector.shape_cast %472 : vector<1x8x1xf32> to vector<8x1xf32>
    %474 = vector.extract_strided_slice %457 {offsets = [2, 0], sizes = [1, 128], strides = [1, 1]} : vector<4x128xf32> to vector<1x128xf32>
    %475 = vector.broadcast %473 : vector<8x1xf32> to vector<8x128xf32>
    %476 = vector.broadcast %474 : vector<1x128xf32> to vector<8x128xf32>
    %477 = arith.mulf %475, %476 : vector<8x128xf32>
    %478 = arith.addf %471, %477 : vector<8x128xf32>
    %479 = vector.extract_strided_slice %422 {offsets = [7, 0, 0], sizes = [1, 8, 1], strides = [1, 1, 1]} : vector<8x8x1xf32> to vector<1x8x1xf32>
    %480 = vector.shape_cast %479 : vector<1x8x1xf32> to vector<8x1xf32>
    %481 = vector.extract_strided_slice %457 {offsets = [3, 0], sizes = [1, 128], strides = [1, 1]} : vector<4x128xf32> to vector<1x128xf32>
    %482 = vector.broadcast %480 : vector<8x1xf32> to vector<8x128xf32>
    %483 = vector.broadcast %481 : vector<1x128xf32> to vector<8x128xf32>
    %484 = arith.mulf %482, %483 : vector<8x128xf32>
    %485 = arith.addf %478, %484 : vector<8x128xf32>
    %486 = vector.extract_strided_slice %485 {offsets = [0, 0], sizes = [4, 128], strides = [1, 1]} : vector<8x128xf32> to vector<4x128xf32>
    %487 = vector.extract_strided_slice %485 {offsets = [4, 0], sizes = [4, 128], strides = [1, 1]} : vector<8x128xf32> to vector<4x128xf32>
    %cst_82 = arith.constant 0.000000e+00 : f32
    %488 = vector.broadcast %cst_82 : f32 to vector<4x128xf32>
    %489 = arith.subf %488, %487 : vector<4x128xf32>
    %490 = math.exp %489 : vector<4x128xf32>
    %cst_83 = arith.constant 1.000000e+00 : f32
    %491 = vector.broadcast %cst_83 : f32 to vector<4x128xf32>
    %492 = arith.addf %491, %490 : vector<4x128xf32>
    %cst_84 = arith.constant 1.000000e+00 : f32
    %493 = vector.broadcast %cst_84 : f32 to vector<4x128xf32>
    %494 = arith.divf %493, %492 : vector<4x128xf32>
    %495 = arith.mulf %486, %494 : vector<4x128xf32>
    %496 = arith.addf %415, %495 : vector<4x128xf32>
    %cst_85 = arith.constant 0.000000e+00 : f32
    %497 = vector.broadcast %cst_85 : f32 to vector<4x128xf32>
    %498 = arith.maximumf %496, %497 : vector<4x128xf32>
    %c0_86 = arith.constant 0 : index
    %c0_87 = arith.constant 0 : index
    %499 = vector.load %arg6[%c0_86, %c0_87] : memref<1x4xf32, #tpu.memory_space<vmem>>, vector<1x4xf32>
    %c0_88 = arith.constant 0 : index
    %c0_89 = arith.constant 0 : index
    %500 = vector.load %arg7[%c0_88, %c0_89] : memref<1x1xf32, #tpu.memory_space<vmem>>, vector<1x1xf32>
    %501 = vector.shape_cast %500 : vector<1x1xf32> to vector<1x1xf32>
    %502 = vector.broadcast %501 : vector<1x1xf32> to vector<1x128xf32>
    %503 = vector.extract_strided_slice %499 {offsets = [0, 0], sizes = [1, 1], strides = [1, 1]} : vector<1x4xf32> to vector<1x1xf32>
    %504 = vector.extract_strided_slice %498 {offsets = [0, 0], sizes = [1, 128], strides = [1, 1]} : vector<4x128xf32> to vector<1x128xf32>
    %505 = vector.broadcast %503 : vector<1x1xf32> to vector<1x128xf32>
    %506 = arith.mulf %505, %504 : vector<1x128xf32>
    %507 = arith.addf %502, %506 : vector<1x128xf32>
    %508 = vector.extract_strided_slice %499 {offsets = [0, 1], sizes = [1, 1], strides = [1, 1]} : vector<1x4xf32> to vector<1x1xf32>
    %509 = vector.extract_strided_slice %498 {offsets = [1, 0], sizes = [1, 128], strides = [1, 1]} : vector<4x128xf32> to vector<1x128xf32>
    %510 = vector.broadcast %508 : vector<1x1xf32> to vector<1x128xf32>
    %511 = arith.mulf %510, %509 : vector<1x128xf32>
    %512 = arith.addf %507, %511 : vector<1x128xf32>
    %513 = vector.extract_strided_slice %499 {offsets = [0, 2], sizes = [1, 1], strides = [1, 1]} : vector<1x4xf32> to vector<1x1xf32>
    %514 = vector.extract_strided_slice %498 {offsets = [2, 0], sizes = [1, 128], strides = [1, 1]} : vector<4x128xf32> to vector<1x128xf32>
    %515 = vector.broadcast %513 : vector<1x1xf32> to vector<1x128xf32>
    %516 = arith.mulf %515, %514 : vector<1x128xf32>
    %517 = arith.addf %512, %516 : vector<1x128xf32>
    %518 = vector.extract_strided_slice %499 {offsets = [0, 3], sizes = [1, 1], strides = [1, 1]} : vector<1x4xf32> to vector<1x1xf32>
    %519 = vector.extract_strided_slice %498 {offsets = [3, 0], sizes = [1, 128], strides = [1, 1]} : vector<4x128xf32> to vector<1x128xf32>
    %520 = vector.broadcast %518 : vector<1x1xf32> to vector<1x128xf32>
    %521 = arith.mulf %520, %519 : vector<1x128xf32>
    %522 = arith.addf %517, %521 : vector<1x128xf32>
    %c0_90 = arith.constant 0 : index
    %c0_91 = arith.constant 0 : index
    %c0_92 = arith.constant 0 : index
    %523 = vector.load %arg8[%c0_90, %c0_91, %c0_92] : memref<1x1x128xf32, #tpu.memory_space<vmem>>, vector<1x1x128xf32>
    %524 = vector.shape_cast %523 : vector<1x1x128xf32> to vector<1x128xf32>
    %525 = vector.shape_cast %522 : vector<1x128xf32> to vector<1x1x128xf32>
    tpu.vector_store %arg8[%c0_90, %c0_91, %c0_92], %525 {strides = array<i32>} : memref<1x1x128xf32, #tpu.memory_space<vmem>>, vector<1x1x128xf32>,
    return
  }
  func.func @transform_0(%arg0: i32) -> (i32, i32, i32) {
    %c0_i32 = arith.constant 0 : i32
    %c0_i32_0 = arith.constant 0 : i32
    %c0_i32_1 = arith.constant 0 : i32
    return %arg0, %c0_i32, %c0_i32_0 : i32, i32, i32
  }
  func.func @transform_1(%arg0: i32) -> (i32, i32) {
    %c0_i32 = arith.constant 0 : i32
    %c0_i32_0 = arith.constant 0 : i32
    %c0_i32_1 = arith.constant 0 : i32
    return %c0_i32, %c0_i32_0 : i32, i32
  }
  func.func @transform_2(%arg0: i32) -> (i32, i32) {
    %c0_i32 = arith.constant 0 : i32
    %c0_i32_0 = arith.constant 0 : i32
    %c0_i32_1 = arith.constant 0 : i32
    return %c0_i32, %c0_i32_0 : i32, i32
  }
  func.func @transform_3(%arg0: i32) -> (i32, i32, i32, i32) {
    %c0_i32 = arith.constant 0 : i32
    %c0_i32_0 = arith.constant 0 : i32
    %c0_i32_1 = arith.constant 0 : i32
    %c0_i32_2 = arith.constant 0 : i32
    %c0_i32_3 = arith.constant 0 : i32
    return %c0_i32, %c0_i32_0, %c0_i32_1, %c0_i32_2 : i32, i32, i32, i32
  }
  func.func @transform_4(%arg0: i32) -> (i32, i32, i32) {
    %c0_i32 = arith.constant 0 : i32
    %c0_i32_0 = arith.constant 0 : i32
    %c0_i32_1 = arith.constant 0 : i32
    %c0_i32_2 = arith.constant 0 : i32
    return %c0_i32, %c0_i32_0, %c0_i32_1 : i32, i32, i32
  }
  func.func @transform_5(%arg0: i32) -> (i32, i32) {
    %c0_i32 = arith.constant 0 : i32
    %c0_i32_0 = arith.constant 0 : i32
    %c0_i32_1 = arith.constant 0 : i32
    return %c0_i32, %c0_i32_0 : i32, i32
  }
  func.func @transform_6(%arg0: i32) -> (i32, i32) {
    %c0_i32 = arith.constant 0 : i32
    %c0_i32_0 = arith.constant 0 : i32
    %c0_i32_1 = arith.constant 0 : i32
    return %c0_i32, %c0_i32_0 : i32, i32
  }
  func.func @transform_7(%arg0: i32) -> (i32, i32, i32) {
    %c0_i32 = arith.constant 0 : i32
    %c0_i32_0 = arith.constant 0 : i32
    %c0_i32_1 = arith.constant 0 : i32
    return %arg0, %c0_i32, %c0_i32_0 : i32, i32, i32
  }
}

</mosaic_0001>

<bundles_post_ra>
// kernel: tpu_custom_call.1
= control target key start
LH: loop header
LB: loop body
LE: loop exit
PB: predicated region body
PF: predicated region fallthrough
CT: control target
= control target key end

     0   :  { %s1767_s0 = inlined_call_operand.vmem [shape: f32[2,1,128], index: 0, kind: input, shape index: {}]   ;;  %s1768_s1 = inlined_call_operand.vmem [shape: f32[4,1], index: 1, kind: input, shape index: {}]   ;;  %s1769_s2 = inlined_call_operand.vmem [shape: f32[4,1], index: 2, kind: input, shape index: {}]   ;;  %s1770_s3 = inlined_call_operand.vmem [shape: f32[6,8,8,1], index: 3, kind: input, shape index: {}]   ;;  %s1771_s4 = inlined_call_operand.vmem [shape: f32[6,8,1], index: 4, kind: input, shape index: {}]   ;;  %s1772_s5 = inlined_call_operand.vmem [shape: f32[1,4], index: 5, kind: input, shape index: {}]   ;;  %s1773_s6 = inlined_call_operand.<no memory space> [shape: f32[1,1], index: 6, kind: input, shape index: {}]   ;;  %s1774_s7 = inlined_call_operand.hbm [shape: f32[2,1,128], index: 7, kind: output, shape index: {}]  }
   0x1   :  { %v12_v0 = vstv %s1773_s6 }
   0x2   :  { %13 = vst [vmem:[#allocation2] sm:$0x1] %v12_v0 }
   0x3   :  { %14 = vsyncpa [#allocation4], 0 }
   0x4   :  { %16 = vsyncpa [#allocation4 + $0x1], 0  ;;  %s1391_s26 = smov 0   ;;  %s1393_s27 = smov 0  }
   0x5   :  { %s1395_s28 = smov 0   ;;  %s1397_s29 = smov 0  }
   0x6 LB: > { %s1412_s6 = sadd.s32 4294967295, %s1339_s29   ;;  %s1150_s30 = sadd.s32 4294967294, %s1339_s29   ;;  %s1339_s29 = sphi %s1397_s29, %s1780_s29   ;;  %s1335_s28 = sphi %s1395_s28, %s1779_s28   ;;  %s1331_s27 = sphi %s1393_s27, %s1778_s27   ;;  %s1327_s26 = sphi %s1391_s26, %s1777_s26  }
   0x7   : > { %s1416_s8 = sadd.s32 1, %s1339_s29   ;;  %s181_s9 = sadd.s32 1, %s1335_s28 }
   0x8   : > { %s178_s10 = ssub.s32 %s1339_s29, %s1416_s8  ;;  %p191_p0 = scmp.ne.s32.totalorder %s1335_s28, %s1331_s27 }
   0x9   : > { %p179_p1 = scmp.eq.s32.totalorder %s178_s10, 0  ;;  %p192_p2 = scmp.eq.s32.totalorder %s1412_s6, 1 }
   0xa   : > { %p197_p3 = scmp.ne.s32.totalorder %s1331_s27, %s1327_s26  ;;  %p198_p4 = scmp.eq.s32.totalorder %s1150_s30, 1 }
   0xb   : > { %s1427_s11 = scalar_select %p179_p1, %s1335_s28, %s181_s9  }
   0xc   : > { %p1429_p5 = por %p192_p2, %p191_p0  ;;  %p1433_p6 = por %p198_p4, %p197_p3 }
   0xd   : > { %p1153_p7 = scmp.ge.s32.totalorder %s1339_s29, 1  ;;  %p240_p8 = scmp.lt.s32.totalorder %s1339_s29, 3 }
   0xf   : > { %p241_p9 = pnand %p1153_p7, %p240_p8 }
  0x10   : > { %v275_v1 = vld [vmem:[%s1768_s1] sm:$0xf] (!%p241_p9)  ;;  %v1341_v3 = vmov (!%p241_p9), 0   ;;  %v298_v6 = vld [vmem:[%s1770_s3 + $0x8] sm:$0xff] (!%p241_p9)  ;;  %v299_v7 = vld [vmem:[%s1770_s3 + $0x10] sm:$0xff] (!%p241_p9)  ;;  %p269_p10 = scmp.lt.s32.totalorder (!%p241_p9), %s1412_s6, 1  ;;  %v272_v27 = vlaneseq (!%p241_p9) }
  0x11   : > { %244 = sbr.rel (%p241_p9) target bundleno = 1201 (0x4b1), region = 48  ;;  %v297_v2 = vld [vmem:[%s1770_s3] sm:$0xff] (!%p241_p9)  ;;  %1248 = vset.pattern.permute.xlu0 (!%p241_p9), %v1341_v3  ;;  %1249 = vset.pattern.permute.xlu1 (!%p241_p9), %v1341_v3  ;;  %v300_v8 = vld [vmem:[%s1770_s3 + $0x18] sm:$0xff] (!%p241_p9)  ;;  %v302_v10 = vld [vmem:[%s1770_s3 + $0x28] sm:$0xff] (!%p241_p9)  ;;  %s1342_s23 = smov (!%p241_p9), 127  }
  0x12   : > { %284 = vperm.xlu0 (!%p241_p9), %1248, %v275_v1   ;;  %314 = vperm.xlu1 (!%p241_p9), %1249, %v297_v2   ;;  %v276_v4 = vld [vmem:[%s1769_s2] sm:$0xf] (!%p241_p9)  ;;  %v303_v11 = vld [vmem:[%s1770_s3 + $0x30] sm:$0xff] (!%p241_p9)  ;;  %v304_v12 = vld [vmem:[%s1770_s3 + $0x38] sm:$0xff] (!%p241_p9)  ;;  %v1519_v30 = vand.u32 (!%p241_p9), 127, %v272_v27  ;;  %v318_v39 = vshrl.u32 (!%p241_p9), %v272_v27, 7 }
  0x13   : > { %v305_v5 = vld [vmem:[%s1771_s4] sm:$0xff] (!%p241_p9)  ;;  %v1163_v13 = vld [vmem:[%s1771_s4 + $0x8] sm:$0xff] (!%p241_p9)  ;;  %v1157_v14 = vld [vmem:[%s1770_s3 + $0x50] sm:$0xff] (!%p241_p9)  ;;  %s1343_s15 = smov (!%p241_p9), 1   ;;  %s1200_s20 = sshll.u32 (!%p241_p9), %s1412_s6, 4 }
  0x14   : > { %v301_v9 = vld [vmem:[%s1770_s3 + $0x20] sm:$0xff] (!%p241_p9)  ;;  %v1161_v16 = vld [vmem:[%s1770_s3 + $0x70] sm:$0xff] (!%p241_p9)  ;;  %v1162_v17 = vld [vmem:[%s1770_s3 + $0x78] sm:$0xff] (!%p241_p9)  ;;  %vm295_vm0 = vcmp.lt.s32.totalorder (!%p241_p9), %v1519_v30, 16  ;;  %v1535_v40 = vsub.s32 (!%p241_p9), 0, %v318_v39  ;;  %v1538_v44 = vsub.s32 (!%p241_p9), 1, %v318_v39  ;;  %s1725_s30 = scalar_lea.hbm (!%p241_p9), %s1774_s7, %s1200_s20 }
  0x15   : > { %v1159_v15 = vld [vmem:[%s1770_s3 + $0x60] sm:$0xff] (!%p241_p9)  ;;  %v1172_v18 = vld [vmem:[%s1771_s4 + $0x10] sm:$0xff] (!%p241_p9)  ;;  %v1171_v22 = vld [vmem:[%s1770_s3 + $0xb8] sm:$0xff] (!%p241_p9)  ;;  %v1540_v47 = vsub.s32 (!%p241_p9), 2, %v318_v39  ;;  %v1544_v54 = vsub.s32 (!%p241_p9), 3, %v318_v39  ;;  %vm414_vm1 = vcmp.lt.s32.totalorder (!%p241_p9), %v1519_v30, 15 }
  0x16   : > { %279 = vperm.xlu0 (!%p241_p9), %1248, %v276_v4   ;;  %308 = vperm.xlu1 (!%p241_p9), %1249, %v305_v5   ;;  %v1166_v19 = vld [vmem:[%s1770_s3 + $0x90] sm:$0xff] (!%p241_p9)  ;;  %v1168_v20 = vld [vmem:[%s1770_s3 + $0xa0] sm:$0xff] (!%p241_p9)  ;;  %v1181_v23 = vld [vmem:[%s1771_s4 + $0x18] sm:$0xff] (!%p241_p9)  ;;  %vm535_vm2 = vcmp.lt.s32.totalorder (!%p241_p9), %v1519_v30, 14  ;;  %vm656_vm3 = vcmp.lt.s32.totalorder (!%p241_p9), %v1519_v30, 13 }
  0x17   : > { %v1170_v21 = vld [vmem:[%s1770_s3 + $0xb0] sm:$0xff] (!%p241_p9)  ;;  %v1176_v25 = vld [vmem:[%s1770_s3 + $0xd8] sm:$0xff] (!%p241_p9)  ;;  %v1178_v26 = vld [vmem:[%s1770_s3 + $0xe8] sm:$0xff] (!%p241_p9) }
  0x18   : > { %v1175_v24 = vld [vmem:[%s1770_s3 + $0xd0] sm:$0xff]  ;;  %s270_s19 = scalar_select %p269_p10, %s1412_s6, 1  ;;  %v1155_v35 = vld [vmem:[%s1770_s3 + $0x40] sm:$0xff]  ;;  %v1156_v36 = vld [vmem:[%s1770_s3 + $0x48] sm:$0xff] }
  0x19   : > { %v1158_v37 = vld [vmem:[%s1770_s3 + $0x58] sm:$0xff]  ;;  %v1160_v38 = vld [vmem:[%s1770_s3 + $0x68] sm:$0xff]  ;;  %v1197_v30 = vld [vmem:[%s1770_s3 + $0x170] sm:$0xff]  ;;  %s1347_s6 = smov [#allocation3]  }
  0x1a   : > { %325 = vperm.xlu0 %1248, %v298_v6   ;;  %336 = vperm.xlu1 %1249, %v299_v7   ;;  %s271_s22 = scalar_lea.vmem %s1767_s0, %s270_s19  ;;  %s1281_s14 = sshll.u32 %s1347_s6, 4  ;;  %s1282_s14 = int_to_ptr.vmem [resolvable:$false] %s1281_s14 }
  0x1b   : > { %v1154_v29 = vld [vmem:[%s271_s22] ss:$0 sm:$0xff]  ;;  %s1283_s16 = scalar_lea.vmem %s1282_s14, 32 }
  0x1e   : > { %347 = vperm.xlu0 %1248, %v300_v8   ;;  %360 = vperm.xlu1 %1249, %v301_v9  }
  0x22   : > { %371 = vperm.xlu0 %1248, %v302_v10   ;;  %382 = vperm.xlu1 %1249, %v303_v11  }
  0x26   : > { %393 = vperm.xlu1 %1249, %v304_v12  }
  0x2a   : > { %429 = vperm.xlu1 %1249, %v1163_v13  }
  0x2e   : > { %457 = vperm.xlu1 %1249, %v1157_v14  }
  0x32   : > { %481 = vperm.xlu1 %1249, %v1159_v15  }
  0x36   : > { %503 = vperm.xlu1 %1249, %v1161_v16  }
  0x3a   : > { %514 = vperm.xlu1 %1249, %v1162_v17  }
  0x3e   : > { %550 = vperm.xlu1 %1249, %v1172_v18  }
  0x42   : > { %578 = vperm.xlu1 %1249, %v1166_v19  }
  0x46   : > { %602 = vperm.xlu1 %1249, %v1168_v20  }
  0x4a   : > { %624 = vperm.xlu1 %1249, %v1170_v21  }
  0x4e   : > { %635 = vperm.xlu1 %1249, %v1171_v22  }
  0x52   : > { %671 = vperm.xlu1 %1249, %v1181_v23   ;;  %v1164_v23 = vld [vmem:[%s1770_s3 + $0x80] sm:$0xff] }
  0x56   : > { %701 = vperm.xlu1 %1249, %v1175_v24   ;;  %v1165_v24 = vld [vmem:[%s1770_s3 + $0x88] sm:$0xff] }
  0x5a   : > { %712 = vperm.xlu1 %1249, %v1176_v25   ;;  %v1167_v25 = vld [vmem:[%s1770_s3 + $0x98] sm:$0xff] }
  0x5e   : > { %736 = vperm.xlu1 %1249, %v1178_v26   ;;  %v1169_v26 = vld [vmem:[%s1770_s3 + $0xa8] sm:$0xff] }
  0x91   : > { %v285_v28 = vpop.permute.xlu0 %284  ;;  %v315_v41 = vpop.permute.xlu1 %314 }
  0x92   : > { %v293_v31 = vmul.f32 %v1154_v29, %v285_v28 }
  0x95   : > { %v280_v32 = vpop.permute.xlu0 %279  ;;  %v309_v45 = vpop.permute.xlu1 %308 }
  0x96   : > { %v294_v33 = vadd.f32 %v293_v31, %v280_v32 }
  0x98   : > { %v296_v34 = vsel %vm295_vm0, %v294_v33, 0.0 }
  0x99   : > { %356 = vrot.lane.b32.xlu0 %v296_v34, %s1342_s23  ;;  %v320_v42 = vrot.slane %v296_v34, %v1535_v40  ;;  %v326_v43 = vpop.permute.xlu0 %325  ;;  %v331_v48 = vrot.slane %v296_v34, %v1538_v44  ;;  %v337_v51 = vpop.permute.xlu1 %336  ;;  %v342_v53 = vrot.slane %v296_v34, %v1540_v47  ;;  %v353_v60 = vrot.slane %v296_v34, %v1544_v54 }
  0x9b   : > { %v321_v46 = vmul.f32 %v320_v42, %v315_v41  ;;  %v332_v52 = vmul.f32 %v331_v48, %v326_v43  ;;  %v343_v58 = vmul.f32 %v342_v53, %v337_v51 }
  0x9d   : > { %435 = vperm.xlu0 %1248, %v1155_v35   ;;  %v348_v49 = vpop.permute.xlu0 %347  ;;  %v322_v50 = vadd.f32 %v321_v46, %v309_v45  ;;  %v361_v57 = vpop.permute.xlu1 %360 }
  0x9e   : > { %v354_v62 = vmul.f32 %v353_v60, %v348_v49 }
  0x9f   : > { %v333_v55 = vadd.f32 %v332_v52, %v322_v50 }
  0xa1   : > { %446 = vperm.xlu0 %1248, %v1156_v36   ;;  %v372_v56 = vpop.permute.xlu0 %371  ;;  %v344_v59 = vadd.f32 %v343_v58, %v333_v55  ;;  %v383_v1 = vpop.permute.xlu1 %382 }
  0xa3   : > { %v355_v2 = vadd.f32 %v354_v62, %v344_v59 }
  0xa5   : > { %468 = vperm.xlu0 %1248, %v1158_v37   ;;  %v394_v10 = vpop.permute.xlu1 %393 }
  0xa9   : > { %492 = vperm.xlu0 %1248, %v1160_v38   ;;  %v430_v29 = vpop.permute.xlu1 %429 }
  0xad   : > { %v458_v34 = vpop.permute.xlu1 %457 }
  0xb1   : > { %v482_v41 = vpop.permute.xlu1 %481 }
  0xb5   : > { %v504_v52 = vpop.permute.xlu1 %503 }
  0xb9   : > { %v515_v62 = vpop.permute.xlu1 %514 }
 0x10b   : > { %v357_v61 = vpop.permute.xlu0 %356 }
 0x10c   : > { %v366_v63 = vrot.slane %v357_v61, %v1535_v40  ;;  %v377_v0 = vrot.slane %v357_v61, %v1538_v44  ;;  %v388_v4 = vrot.slane %v357_v61, %v1540_v47  ;;  %v399_v7 = vrot.slane %v357_v61, %v1544_v54 }
 0x10e   : > { %v367_v3 = vmul.f32 %v366_v63, %v361_v57  ;;  %v378_v6 = vmul.f32 %v377_v0, %v372_v56  ;;  %v389_v9 = vmul.f32 %v388_v4, %v383_v1  ;;  %v400_v12 = vmul.f32 %v399_v7, %v394_v10 }
 0x110   : > { %v368_v5 = vadd.f32 %v367_v3, %v355_v2 }
 0x112   : > { %v379_v8 = vadd.f32 %v378_v6, %v368_v5 }
 0x114   : > { %v390_v11 = vadd.f32 %v389_v9, %v379_v8 }
 0x116   : > { %v401_v13 = vadd.f32 %v400_v12, %v390_v11  ;;  %v1173_v11 = vld [vmem:[%s1770_s3 + $0xc0] sm:$0xff]  ;;  %v1174_v12 = vld [vmem:[%s1770_s3 + $0xc8] sm:$0xff] }
 0x118   : > { %v402_v14 = vsub.f32 0.0, %v401_v13 }
 0x11a   : > { %v403_v15 = vmul.f32 1.442695, %v402_v14 }
 0x11c   : > { %1253 = vpow2.f32 %v403_v15  ;;  %v436_v27 = vpop.permute.xlu0 %435  ;;  %v551_v15 = vpop.permute.xlu1 %550 }
 0x120   : > { %v447_v31 = vpop.permute.xlu0 %446 }
 0x124   : > { %v469_v35 = vpop.permute.xlu0 %468 }
 0x126   : > { %v1254_v16 = vpop.eup %1253 }
 0x127   : > { %v405_v17 = vadd.f32 1.0, %v1254_v16 }
 0x128   : > { %v493_v42 = vpop.permute.xlu0 %492 }
 0x129   : > { %1255 = vrcp.f32 %v405_v17 }
 0x133   : > { %v1256_v18 = vpop.eup %1255 }
 0x134   : > { %v409_v19 = vrot.slane %v1256_v18, 4 }
 0x136   : > { %v1551_v20 = vmul.f32 %v409_v19, %v401_v13  ;;  %v579_v19 = vpop.permute.xlu1 %578 }
 0x138   : > { %v413_v21 = vadd.f32 %v1551_v20, %v357_v61 }
 0x13a   : > { %v415_v22 = vsel %vm414_vm1, %v413_v21, 0.0 }
 0x13b   : > { %477 = vrot.lane.b32.xlu0 %v415_v22, %s1342_s23  ;;  %v441_v28 = vrot.slane %v415_v22, %v1535_v40  ;;  %v452_v33 = vrot.slane %v415_v22, %v1538_v44  ;;  %v463_v38 = vrot.slane %v415_v22, %v1540_v47  ;;  %v474_v45 = vrot.slane %v415_v22, %v1544_v54 }
 0x13d   : > { %v442_v32 = vmul.f32 %v441_v28, %v436_v27  ;;  %v453_v37 = vmul.f32 %v452_v33, %v447_v31  ;;  %v464_v43 = vmul.f32 %v463_v38, %v458_v34  ;;  %v475_v49 = vmul.f32 %v474_v45, %v469_v35 }
 0x13f   : > { %556 = vperm.xlu0 %1248, %v1164_v23   ;;  %v443_v36 = vadd.f32 %v442_v32, %v430_v29 }
 0x141   : > { %v454_v39 = vadd.f32 %v453_v37, %v443_v36 }
 0x143   : > { %567 = vperm.xlu0 %1248, %v1165_v24   ;;  %v465_v46 = vadd.f32 %v464_v43, %v454_v39 }
 0x145   : > { %v476_v53 = vadd.f32 %v475_v49, %v465_v46 }
 0x147   : > { %589 = vperm.xlu0 %1248, %v1167_v25  }
 0x14b   : > { %613 = vperm.xlu0 %1248, %v1169_v26   ;;  %v603_v26 = vpop.permute.xlu1 %602 }
 0x14f   : > { %v625_v36 = vpop.permute.xlu1 %624 }
 0x1ad   : > { %v478_v48 = vpop.permute.xlu0 %477 }
 0x1ae   : > { %v487_v50 = vrot.slane %v478_v48, %v1535_v40  ;;  %v498_v51 = vrot.slane %v478_v48, %v1538_v44  ;;  %v509_v56 = vrot.slane %v478_v48, %v1540_v47  ;;  %v520_v59 = vrot.slane %v478_v48, %v1544_v54 }
 0x1b0   : > { %v488_v55 = vmul.f32 %v487_v50, %v482_v41  ;;  %v499_v58 = vmul.f32 %v498_v51, %v493_v42  ;;  %v510_v61 = vmul.f32 %v509_v56, %v504_v52  ;;  %v521_v0 = vmul.f32 %v520_v59, %v515_v62 }
 0x1b2   : > { %v489_v57 = vadd.f32 %v488_v55, %v476_v53 }
 0x1b4   : > { %v500_v60 = vadd.f32 %v499_v58, %v489_v57 }
 0x1b6   : > { %v511_v63 = vadd.f32 %v510_v61, %v500_v60 }
 0x1b8   : > { %v522_v1 = vadd.f32 %v521_v0, %v511_v63  ;;  %v1177_v0 = vld [vmem:[%s1770_s3 + $0xe0] sm:$0xff] }
 0x1ba   : > { %v523_v2 = vsub.f32 0.0, %v522_v1 }
 0x1bc   : > { %v524_v3 = vmul.f32 1.442695, %v523_v2  ;;  %v1179_v2 = vld [vmem:[%s1770_s3 + $0xf0] sm:$0xff] }
 0x1be   : > { %1257 = vpow2.f32 %v524_v3  ;;  %v557_v13 = vpop.permute.xlu0 %556  ;;  %v1180_v3 = vld [vmem:[%s1770_s3 + $0xf8] sm:$0xff] }
 0x1c2   : > { %v568_v16 = vpop.permute.xlu0 %567 }
 0x1c6   : > { %v590_v21 = vpop.permute.xlu0 %589 }
 0x1c8   : > { %v1258_v4 = vpop.eup %1257 }
 0x1c9   : > { %v526_v5 = vadd.f32 1.0, %v1258_v4  ;;  %v1190_v4 = vld [vmem:[%s1771_s4 + $0x20] sm:$0xff] }
 0x1ca   : > { %v614_v27 = vpop.permute.xlu0 %613 }
 0x1cb   : > { %1259 = vrcp.f32 %v526_v5  ;;  %v1184_v5 = vld [vmem:[%s1770_s3 + $0x110] sm:$0xff] }
 0x1d5   : > { %v1260_v6 = vpop.eup %1259 }
 0x1d6   : > { %v530_v7 = vrot.slane %v1260_v6, 4  ;;  %v1185_v6 = vld [vmem:[%s1770_s3 + $0x118] sm:$0xff] }
 0x1d8   : > { %v532_v8 = vmul.f32 %v530_v7, %v522_v1  ;;  %v1183_v1 = vld [vmem:[%s1770_s3 + $0x108] sm:$0xff] }
 0x1d9   : > { %v1187_v7 = vld [vmem:[%s1770_s3 + $0x128] sm:$0xff] }
 0x1da   : > { %v534_v9 = vadd.f32 %v532_v8, %v478_v48  ;;  %v636_v48 = vpop.permute.xlu1 %635  ;;  %v533_v60 = vadd.f32 %v532_v8, %v1551_v20  ;;  %v1182_v20 = vld [vmem:[%s1770_s3 + $0x100] sm:$0xff] }
 0x1dc   : > { %v536_v10 = vsel %vm535_vm2, %v534_v9, 0.0 }
 0x1dd   : > { %598 = vrot.lane.b32.xlu0 %v536_v10, %s1342_s23  ;;  %v562_v14 = vrot.slane %v536_v10, %v1535_v40  ;;  %v573_v18 = vrot.slane %v536_v10, %v1538_v44  ;;  %v584_v24 = vrot.slane %v536_v10, %v1540_v47  ;;  %v595_v29 = vrot.slane %v536_v10, %v1544_v54 }
 0x1de   : > { %v672_v9 = vpop.permute.xlu1 %671 }
 0x1df   : > { %v563_v17 = vmul.f32 %v562_v14, %v557_v13  ;;  %v574_v23 = vmul.f32 %v573_v18, %v568_v16  ;;  %v585_v28 = vmul.f32 %v584_v24, %v579_v19  ;;  %v596_v33 = vmul.f32 %v595_v29, %v590_v21 }
 0x1e1   : > { %679 = vperm.xlu0 %1248, %v1173_v11   ;;  %v564_v22 = vadd.f32 %v563_v17, %v551_v15 }
 0x1e2   : > { %v702_v11 = vpop.permute.xlu1 %701 }
 0x1e3   : > { %v575_v25 = vadd.f32 %v574_v23, %v564_v22 }
 0x1e5   : > { %690 = vperm.xlu0 %1248, %v1174_v12   ;;  %v586_v31 = vadd.f32 %v585_v28, %v575_v25 }
 0x1e6   : > { %v713_v14 = vpop.permute.xlu1 %712 }
 0x1e7   : > { %v597_v37 = vadd.f32 %v596_v33, %v586_v31 }
 0x1ea   : > { %v737_v21 = vpop.permute.xlu1 %736 }
 0x24f   : > { %v599_v32 = vpop.permute.xlu0 %598 }
 0x250   : > { %v608_v34 = vrot.slane %v599_v32, %v1535_v40  ;;  %v619_v35 = vrot.slane %v599_v32, %v1538_v44  ;;  %v630_v39 = vrot.slane %v599_v32, %v1540_v47  ;;  %v641_v43 = vrot.slane %v599_v32, %v1544_v54 }
 0x252   : > { %v609_v38 = vmul.f32 %v608_v34, %v603_v26  ;;  %v620_v42 = vmul.f32 %v619_v35, %v614_v27  ;;  %v631_v45 = vmul.f32 %v630_v39, %v625_v36  ;;  %v642_v50 = vmul.f32 %v641_v43, %v636_v48 }
 0x254   : > { %v610_v41 = vadd.f32 %v609_v38, %v597_v37 }
 0x256   : > { %v621_v46 = vadd.f32 %v620_v42, %v610_v41 }
 0x258   : > { %v632_v49 = vadd.f32 %v631_v45, %v621_v46 }
 0x25a   : > { %v643_v51 = vadd.f32 %v642_v50, %v632_v49 }
 0x25c   : > { %v644_v52 = vsub.f32 0.0, %v643_v51 }
 0x25e   : > { %v645_v53 = vmul.f32 1.442695, %v644_v52 }
 0x260   : > { %1261 = vpow2.f32 %v645_v53  ;;  %v680_v8 = vpop.permute.xlu0 %679 }
 0x264   : > { %v691_v10 = vpop.permute.xlu0 %690 }
 0x26a   : > { %v1262_v55 = vpop.eup %1261 }
 0x26b   : > { %v647_v56 = vadd.f32 1.0, %v1262_v55 }
 0x26d   : > { %1263 = vrcp.f32 %v647_v56 }
 0x277   : > { %v1264_v57 = vpop.eup %1263 }
 0x278   : > { %v651_v58 = vrot.slane %v1264_v57, 4 }
 0x27a   : > { %v653_v59 = vmul.f32 %v651_v58, %v643_v51 }
 0x27c   : > { %v655_v61 = vadd.f32 %v653_v59, %v599_v32  ;;  %v1594_v62 = vadd.f32 %v653_v59, %v533_v60  ;;  %v1191_v59 = vld [vmem:[%s1770_s3 + $0x140] sm:$0xff] }
 0x27d   : > { %v1186_v60 = vld [vmem:[%s1770_s3 + $0x120] sm:$0xff] }
 0x27e   : > { %v1598_v63 = vsel %vm656_vm3, %v655_v61, 0.0  ;;  %v1192_v61 = vld [vmem:[%s1770_s3 + $0x148] sm:$0xff] }
 0x27f   : > { %721 = vrot.lane.b32.xlu1 %v1598_v63, %s1342_s23  ;;  %675 = vrot.lane.b32.xlu0 %v1598_v63, %s1343_s15 }
 0x283   : > { %801 = vperm.xlu1 %1249, %v1182_v20   ;;  %725 = vperm.xlu0 %1248, %v1177_v0   ;;  %v1199_v20 = vld [vmem:[%s1771_s4 + $0x28] sm:$0xff]  ;;  %v1193_v0 = vld [vmem:[%s1770_s3 + $0x150] sm:$0xff] }
 0x287   : > { %812 = vperm.xlu1 %1249, %v1183_v1   ;;  %747 = vperm.xlu0 %1248, %v1179_v2   ;;  %v1194_v1 = vld [vmem:[%s1770_s3 + $0x158] sm:$0xff]  ;;  %v1196_v2 = vld [vmem:[%s1770_s3 + $0x168] sm:$0xff] }
 0x28b   : > { %758 = vperm.xlu0 %1248, %v1180_v3  }
 0x28f   : > { %793 = vperm.xlu0 %1248, %v1190_v4  }
 0x293   : > { %823 = vperm.xlu0 %1248, %v1184_v5  }
 0x297   : > { %834 = vperm.xlu0 %1248, %v1185_v6  }
 0x29b   : > { %858 = vperm.xlu0 %1248, %v1187_v7  }
 0x2f1   : > { %v676_v12 = vpop.permute.xlu0 %675  ;;  %v722_v25 = vpop.permute.xlu1 %721 }
 0x2f2   : > { %v685_v13 = vrot.slane %v676_v12, %v1535_v40  ;;  %v696_v16 = vrot.slane %v676_v12, %v1538_v44  ;;  %v707_v19 = vrot.slane %v676_v12, %v1540_v47  ;;  %v718_v24 = vrot.slane %v676_v12, %v1544_v54 }
 0x2f3   : > { %v742_v27 = vrot.slane %v722_v25, %v1538_v44  ;;  %v731_v29 = vrot.slane %v722_v25, %v1535_v40  ;;  %v753_v36 = vrot.slane %v722_v25, %v1540_v47  ;;  %v764_v41 = vrot.slane %v722_v25, %v1544_v54 }
 0x2f4   : > { %v686_v15 = vmul.f32 %v685_v13, %v680_v8  ;;  %v697_v18 = vmul.f32 %v696_v16, %v691_v10  ;;  %v708_v23 = vmul.f32 %v707_v19, %v702_v11  ;;  %v719_v28 = vmul.f32 %v718_v24, %v713_v14 }
 0x2f5   : > { %v743_v35 = vmul.f32 %v742_v27, %v737_v21 }
 0x2f6   : > { %v687_v17 = vadd.f32 %v686_v15, %v672_v9 }
 0x2f8   : > { %v698_v22 = vadd.f32 %v697_v18, %v687_v17 }
 0x2fa   : > { %v709_v26 = vadd.f32 %v708_v23, %v698_v22 }
 0x2fc   : > { %v720_v32 = vadd.f32 %v719_v28, %v709_v26 }
 0x302   : > { %v726_v31 = vpop.permute.xlu0 %725  ;;  %v802_v3 = vpop.permute.xlu1 %801 }
 0x303   : > { %v732_v33 = vmul.f32 %v731_v29, %v726_v31 }
 0x305   : > { %v733_v34 = vadd.f32 %v732_v33, %v720_v32 }
 0x306   : > { %v748_v37 = vpop.permute.xlu0 %747  ;;  %v813_v5 = vpop.permute.xlu1 %812 }
 0x307   : > { %v744_v38 = vadd.f32 %v743_v35, %v733_v34  ;;  %v754_v39 = vmul.f32 %v753_v36, %v748_v37 }
 0x309   : > { %v755_v43 = vadd.f32 %v754_v39, %v744_v38 }
 0x30a   : > { %v759_v42 = vpop.permute.xlu0 %758 }
 0x30b   : > { %v765_v45 = vmul.f32 %v764_v41, %v759_v42 }
 0x30d   : > { %v766_v46 = vadd.f32 %v765_v45, %v755_v43 }
 0x30e   : > { %v794_v4 = vpop.permute.xlu0 %793 }
 0x30f   : > { %v767_v48 = vsub.f32 0.0, %v766_v46 }
 0x311   : > { %v768_v49 = vmul.f32 1.442695, %v767_v48 }
 0x312   : > { %v824_v6 = vpop.permute.xlu0 %823 }
 0x313   : > { %1265 = vpow2.f32 %v768_v49 }
 0x316   : > { %v835_v9 = vpop.permute.xlu0 %834 }
 0x31a   : > { %v859_v15 = vpop.permute.xlu0 %858 }
 0x31d   : > { %v1266_v50 = vpop.eup %1265 }
 0x31e   : > { %v770_v51 = vadd.f32 1.0, %v1266_v50 }
 0x320   : > { %1267 = vrcp.f32 %v770_v51 }
 0x32a   : > { %v1268_v52 = vpop.eup %1267 }
 0x32b   : > { %v774_v53 = vrot.slane %v1268_v52, 4 }
 0x32d   : > { %v776_v55 = vmul.f32 %v774_v53, %v766_v46  ;;  %v1023_v53 = vld [vmem:[%s1772_s5] sm:$0x1] }
 0x32f   : > { %v1640_v56 = vadd.f32 %v776_v55, %v1594_v62  ;;  %v778_v57 = vadd.f32 %v776_v55, %v1598_v63  ;;  %v1188_v62 = vld [vmem:[%s1770_s3 + $0x130] sm:$0xff]  ;;  %v1189_v63 = vld [vmem:[%s1770_s3 + $0x138] sm:$0xff]  ;;  %v1195_v55 = vld [vmem:[%s1770_s3 + $0x160] sm:$0xff] }
 0x331   : > { %v1645_v58 = vsel %vm656_vm3, %v778_v57, 0.0  ;;  %v1198_v57 = vld [vmem:[%s1770_s3 + $0x178] sm:$0xff] }
 0x332   : > { %843 = vrot.lane.b32.xlu0 %v1645_v58, %s1342_s23  ;;  %797 = vrot.lane.b32.xlu1 %v1645_v58, %s1343_s15 }
 0x336   : > { %923 = vperm.xlu0 %1248, %v1191_v59   ;;  %847 = vperm.xlu1 %1249, %v1186_v60   ;;  %v1345_v59 = vmov 1   ;;  %v1346_v60 = vmov 3  }
 0x33a   : > { %934 = vperm.xlu0 %1248, %v1192_v61   ;;  %869 = vperm.xlu1 %1249, %v1188_v62  }
 0x33e   : > { %880 = vperm.xlu1 %1249, %v1189_v63  }
 0x342   : > { %915 = vperm.xlu1 %1249, %v1199_v20  }
 0x346   : > { %945 = vperm.xlu1 %1249, %v1193_v0  }
 0x34a   : > { %956 = vperm.xlu1 %1249, %v1194_v1  }
 0x34e   : > { %980 = vperm.xlu1 %1249, %v1196_v2  }
 0x3a4   : > { %v798_v7 = vpop.permute.xlu1 %797  ;;  %v844_v19 = vpop.permute.xlu0 %843 }
 0x3a5   : > { %v807_v8 = vrot.slane %v798_v7, %v1535_v40  ;;  %v818_v11 = vrot.slane %v798_v7, %v1538_v44  ;;  %v829_v14 = vrot.slane %v798_v7, %v1540_v47  ;;  %v840_v18 = vrot.slane %v798_v7, %v1544_v54 }
 0x3a6   : > { %v864_v22 = vrot.slane %v844_v19, %v1538_v44  ;;  %v853_v24 = vrot.slane %v844_v19, %v1535_v40  ;;  %v875_v31 = vrot.slane %v844_v19, %v1540_v47  ;;  %v886_v35 = vrot.slane %v844_v19, %v1544_v54 }
 0x3a7   : > { %v808_v10 = vmul.f32 %v807_v8, %v802_v3  ;;  %v819_v13 = vmul.f32 %v818_v11, %v813_v5  ;;  %v830_v17 = vmul.f32 %v829_v14, %v824_v6  ;;  %v841_v23 = vmul.f32 %v840_v18, %v835_v9 }
 0x3a8   : > { %v865_v29 = vmul.f32 %v864_v22, %v859_v15 }
 0x3a9   : > { %v809_v12 = vadd.f32 %v808_v10, %v794_v4 }
 0x3ab   : > { %v820_v16 = vadd.f32 %v819_v13, %v809_v12 }
 0x3ad   : > { %v831_v21 = vadd.f32 %v830_v17, %v820_v16 }
 0x3af   : > { %v842_v26 = vadd.f32 %v841_v23, %v831_v21 }
 0x3b5   : > { %v848_v25 = vpop.permute.xlu1 %847  ;;  %v924_v61 = vpop.permute.xlu0 %923 }
 0x3b6   : > { %v854_v27 = vmul.f32 %v853_v24, %v848_v25 }
 0x3b8   : > { %v855_v28 = vadd.f32 %v854_v27, %v842_v26 }
 0x3b9   : > { %v870_v32 = vpop.permute.xlu1 %869  ;;  %v935_v63 = vpop.permute.xlu0 %934 }
 0x3ba   : > { %v866_v33 = vadd.f32 %v865_v29, %v855_v28  ;;  %v876_v34 = vmul.f32 %v875_v31, %v870_v32 }
 0x3bc   : > { %v877_v37 = vadd.f32 %v876_v34, %v866_v33 }
 0x3bd   : > { %v881_v36 = vpop.permute.xlu1 %880 }
 0x3be   : > { %v887_v38 = vmul.f32 %v886_v35, %v881_v36 }
 0x3c0   : > { %v888_v39 = vadd.f32 %v887_v38, %v877_v37 }
 0x3c1   : > { %v916_v62 = vpop.permute.xlu1 %915 }
 0x3c2   : > { %v889_v41 = vsub.f32 0.0, %v888_v39 }
 0x3c4   : > { %v890_v42 = vmul.f32 1.442695, %v889_v41 }
 0x3c5   : > { %v946_v20 = vpop.permute.xlu1 %945 }
 0x3c6   : > { %1269 = vpow2.f32 %v890_v42 }
 0x3c9   : > { %v957_v2 = vpop.permute.xlu1 %956 }
 0x3cd   : > { %v981_v8 = vpop.permute.xlu1 %980 }
 0x3d0   : > { %v1270_v43 = vpop.eup %1269 }
 0x3d1   : > { %v892_v45 = vadd.f32 1.0, %v1270_v43 }
 0x3d3   : > { %1271 = vrcp.f32 %v892_v45 }
 0x3dd   : > { %v1272_v46 = vpop.eup %1271 }
 0x3de   : > { %v896_v48 = vrot.slane %v1272_v46, 4 }
 0x3e0   : > { %v898_v49 = vmul.f32 %v896_v48, %v888_v39 }
 0x3e2   : > { %v1687_v50 = vadd.f32 %v898_v49, %v1640_v56  ;;  %v900_v51 = vadd.f32 %v898_v49, %v1645_v58  ;;  %v1024_v56 = vld [vmem:[#allocation2] sm:$0x1]  ;;  %v1344_v58 = vmov 2  }
 0x3e4   : > { %v901_v52 = vsel %vm656_vm3, %v900_v51, 0.0 }
 0x3e5   : > { %965 = vrot.lane.b32.xlu1 %v901_v52, %s1342_s23  ;;  %919 = vrot.lane.b32.xlu0 %v901_v52, %s1343_s15  ;;  %s267_s15 = sand.u32 1, %s1331_s27  }
 0x3e6   : > { %s268_s21 = scalar_lea.vmem [#allocation3], %s267_s15  ;;  %s1086_s9 = scalar_lea.sflag [#allocation4], %s267_s15 }
 0x3e7   : > { %s1098_s22 = sshll.u32 %s268_s21, 4  ;;  %s1727_s22 = int_to_ptr.vmem [resolvable:$true] %s1098_s22 }
 0x3e8   : > { %s1277_s10 = scalar_lea.vmem %s1727_s22, 16  ;;  %p1284_p0 = scmp.lt.s32.totalorder %s1727_s22, %s1282_s14 }
 0x3e9   : > { %1036 = vperm.xlu1 %1249, %v1023_v53   ;;  %969 = vperm.xlu0 %1248, %v1195_v55   ;;  %p1278_p11 = scmp.ne.s32.totalorder %s1727_s22, %s1277_s10  ;;  %p1285_p1 = scmp.lt.s32.totalorder %s1283_s16, %s1277_s10 }
 0x3eb   : > { %p1279_p12 = pnand %p1278_p11, %p1429_p5  ;;  %p1286_p2 = por %p1285_p1, %p1284_p0 }
 0x3ed   : > { %1027 = vperm.xlu1 %1249, %v1024_v56   ;;  %991 = vperm.xlu0 %1248, %v1197_v30   ;;  %p1280_p13 = pneg %p1279_p12 }
 0x3ef   : > { %p1287_p3 = pnand %p1286_p2, %p1280_p13 }
 0x3f1   : > { %1002 = vperm.xlu0 %1248, %v1198_v57   ;;  %1251 = vset.pattern.permute.xlu1 %v1344_v58 }
 0x3f2   : > { %1059 = vperm.xlu1 %1251, %v1023_v53  }
 0x3f5   : > { %1250 = vset.pattern.permute.xlu0 %v1345_v59 }
 0x3f6   : > { %1046 = vperm.xlu0 %1250, %v1023_v53  }
 0x3fa   : > { %1252 = vset.pattern.permute.xlu0 %v1346_v60 }
 0x3fb   : > { %1072 = vperm.xlu0 %1252, %v1023_v53  }
 0x457   : > { %v920_v0 = vpop.permute.xlu0 %919  ;;  %v966_v12 = vpop.permute.xlu1 %965 }
 0x458   : > { %v929_v1 = vrot.slane %v920_v0, %v1535_v40  ;;  %v940_v4 = vrot.slane %v920_v0, %v1538_v44  ;;  %v951_v7 = vrot.slane %v920_v0, %v1540_v47  ;;  %v962_v11 = vrot.slane %v920_v0, %v1544_v54 }
 0x459   : > { %v986_v14 = vrot.slane %v966_v12, %v1538_v44  ;;  %v975_v16 = vrot.slane %v966_v12, %v1535_v40  ;;  %v997_v23 = vrot.slane %v966_v12, %v1540_v47  ;;  %v1008_v27 = vrot.slane %v966_v12, %v1544_v54 }
 0x45a   : > { %v930_v3 = vmul.f32 %v929_v1, %v924_v61  ;;  %v941_v6 = vmul.f32 %v940_v4, %v935_v63  ;;  %v952_v10 = vmul.f32 %v951_v7, %v946_v20  ;;  %v963_v15 = vmul.f32 %v962_v11, %v957_v2 }
 0x45b   : > { %v987_v22 = vmul.f32 %v986_v14, %v981_v8 }
 0x45c   : > { %v931_v5 = vadd.f32 %v930_v3, %v916_v62 }
 0x45e   : > { %v942_v9 = vadd.f32 %v941_v6, %v931_v5 }
 0x460   : > { %v953_v13 = vadd.f32 %v952_v10, %v942_v9 }
 0x462   : > { %v964_v18 = vadd.f32 %v963_v15, %v953_v13 }
 0x468   : > { %v970_v17 = vpop.permute.xlu0 %969  ;;  %v1037_v36 = vpop.permute.xlu1 %1036 }
 0x469   : > { %v976_v19 = vmul.f32 %v975_v16, %v970_v17  ;;  %v1042_v48 = vrot.slane %v1037_v36, %v1535_v40 }
 0x46b   : > { %v977_v21 = vadd.f32 %v976_v19, %v964_v18 }
 0x46c   : > { %v992_v24 = vpop.permute.xlu0 %991  ;;  %v1028_v37 = vpop.permute.xlu1 %1027 }
 0x46d   : > { %v988_v25 = vadd.f32 %v987_v22, %v977_v21  ;;  %v998_v26 = vmul.f32 %v997_v23, %v992_v24  ;;  %v1033_v52 = vrot.slane %v1028_v37, %v1535_v40 }
 0x46f   : > { %v999_v29 = vadd.f32 %v998_v26, %v988_v25 }
 0x470   : > { %v1003_v28 = vpop.permute.xlu0 %1002 }
 0x471   : > { %v1009_v31 = vmul.f32 %v1008_v27, %v1003_v28  ;;  %v1060_v41 = vpop.permute.xlu1 %1059 }
 0x472   : > { %v1065_v46 = vrot.slane %v1060_v41, %v1535_v40 }
 0x473   : > { %v1010_v32 = vadd.f32 %v1009_v31, %v999_v29 }
 0x475   : > { %v1011_v44 = vsub.f32 0.0, %v1010_v32  ;;  %v1047_v38 = vpop.permute.xlu0 %1046 }
 0x476   : > { %v1052_v45 = vrot.slane %v1047_v38, %v1535_v40 }
 0x477   : > { %v1012_v33 = vmul.f32 1.442695, %v1011_v44 }
 0x479   : > { %1273 = vpow2.f32 %v1012_v33 }
 0x47a   : > { %v1073_v43 = vpop.permute.xlu0 %1072 }
 0x47b   : > { %v1078_v51 = vrot.slane %v1073_v43, %v1535_v40 }
 0x483   : > { %v1274_v34 = vpop.eup %1273 }
 0x484   : > { %v1014_v35 = vadd.f32 1.0, %v1274_v34 }
 0x486   : > { %1275 = vrcp.f32 %v1014_v35 }
 0x490   : > { %v1276_v47 = vpop.eup %1275 }
 0x491   : > { %v1018_v39 = vrot.slane %v1276_v47, 4 }
 0x493   : > { %v1020_v42 = vmul.f32 %v1018_v39, %v1010_v32 }
 0x495   : > { %v1021_v54 = vadd.f32 %v1020_v42, %v1687_v50 }
 0x497   : > { %v1022_v49 = vmax.f32 %v1021_v54, 0.0 }
 0x499   : > { %v1043_v53 = vmul.f32 %v1042_v48, %v1022_v49  ;;  %v1053_v55 = vmul.f32 %v1052_v45, %v1022_v49  ;;  %v1066_v56 = vmul.f32 %v1065_v46, %v1022_v49  ;;  %v1079_v50 = vmul.f32 %v1078_v51, %v1022_v49 }
 0x49b   : > { %v1044_v30 = vadd.f32 %v1043_v53, %v1033_v52  ;;  %v1055_v57 = vrot.slane %v1053_v55, 1  ;;  %v1068_v59 = vrot.slane %v1066_v56, 2  ;;  %v1081_v61 = vrot.slane %v1079_v50, 3 }
 0x49d   : > { %v1057_v58 = vadd.f32 %v1055_v57, %v1044_v30 }
 0x49f   : > { %v1070_v60 = vadd.f32 %v1068_v59, %v1057_v58 }
 0x4a1   : > { %v1083_v62 = vadd.f32 %v1081_v61, %v1070_v60 }
 0x4a3   : > { %1084 = vst [vmem:[%s268_s21] sm:$0x1] %v1083_v62 }
 0x4a4   : > { %1290 = shalt.err (!%p1287_p3)
}
 0x4a5   : > { %s1291_s17 = scalar_lea.hbm %s1725_s30, 16  ;;  %s1295_s19 = scalar_lea.hbm %s1774_s7, 32 }
 0x4a6   : > { %p1292_p4 = scmp.ne.s32.totalorder %s1725_s30, %s1291_s17  ;;  %p1296_p9 = scmp.lt.u32.totalorder %s1725_s30, %s1774_s7 }
 0x4a7   : > { %p1297_p10 = scmp.lt.u32.totalorder %s1295_s19, %s1291_s17  ;;  %p1299_p12 = scmp.lt.u32.totalorder %s1291_s17, %s1725_s30 }
 0x4a8   : > { %p1293_p7 = pnand %p1292_p4, %p1429_p5 }
 0x4a9   : > { %p1298_p11 = por %p1297_p10, %p1296_p9 }
 0x4aa   : > { %p1294_p8 = pneg %p1293_p7 }
 0x4ab   : > { %p1300_p13 = por %p1299_p12, %p1298_p11 }
 0x4ad   : > { %p1301_p0 = pnand %p1300_p13, %p1294_p8 }
 0x4af   : > { %1304 = shalt.err (!%p1301_p0)
}
 0x4b0   : > { %1203 = dma.vmem_to_hbm [thread:$0]  (%p1429_p5), %s1727_s22, 16, %s1725_s30, %s1086_s9  }
 0x4b1 PF: > { %p1209_p1 = scmp.ge.s32.totalorder %s1339_s29, 2  ;;  %s1110_s21 = sand.u32 1, %s1327_s26  }
 0x4b2   : > { %s1111_s24 = scalar_lea.sflag [#allocation4], %s1110_s21 }
 0x4b3   : > { %p1206_p2 = pnand %p1209_p1, %p1433_p6 }
 0x4b5   : > { %1322 = dma.done.wait (!%p1206_p2), %s1111_s24, 16  }
 0x4b6   : > { %1324 = vsyncadd (!%p1206_p2), %s1111_s24, 4294967280  ;;  %p19_p3 = scmp.ge.s32.totalorder %s1416_s8, 4   ;;  %s1777_s26 = smov %s1331_s27 }
 0x4b7   : > { %s1778_s27 = smov %s1335_s28  ;;  %s1779_s28 = smov %s1427_s11 }
 0x4b8   : > { %s1780_s29 = smov %s1416_s8  ;;  %21 = sbr.rel (!%p19_p3) target bundleno = 6 (0x6), region = 93 }
 0x4bf   :  { %1115 = vsyncpa [#allocation4], 1 }
 0x4c0   :  { %1117 = vsyncpa [#allocation4 + $0x1], 1 }

</bundles_post_ra>
